<compile_context>
chip_gen: v6e
topology: v6e:2x2x1
jax: 0.10.0
libtpu: 0.0.40
codegen_flags: <defaults>
</compile_context>

<pallas_src>
import jax
import jax.numpy as jnp
import numpy as np
from jax import lax
from jax.experimental import pallas as pl
from jax.experimental.pallas import tpu as pltpu


# ---------------------------------------------------------------------------
# Pallas kernel.  Per grid step it sees one slab of g region-rows:
#   x_ref : (C, g, k1[, k2], W)        predictions (any float dtype)
#   y_ref : (g, k1[, k2], W) int32     label map      (y_is_labels=True)
#           (C, g, k1[, k2], W) float  dense one-hot  (y_is_labels=False)
#   m_ref : (g, k1[, k2], W) float     loss mask      (only if has_mask)
#   sx/sy/st_ref : (C, g, W) float32   batch-accumulated window-row sums of
#                                      x*m, y*m, x*y*m  (outputs = accumulators)
# ---------------------------------------------------------------------------
def _make_kernel(*, dim, num_classes, y_is_labels, has_mask):
    n_win = dim - 1          # window-row axes reduced inside the kernel
    batch_axis = dim - 1     # innermost grid axis == batch (reduction)

    def _window_sum(t):
        for _ in range(n_win):
            t = t.sum(axis=-2)          # always the current sublane axis: cheap
        return t

    def _body(x_ref, y_ref, m_ref, sx_ref, sy_ref, st_ref):
        b = pl.program_id(batch_axis)

        @pl.when(b == 0)
        def _():
            sx_ref[...] = jnp.zeros_like(sx_ref)
            sy_ref[...] = jnp.zeros_like(sy_ref)
            st_ref[...] = jnp.zeros_like(st_ref)

        x = x_ref[...].astype(jnp.float32)              # (C, g, ..., W)

        if has_mask:
            m = m_ref[...].astype(jnp.float32)[jnp.newaxis]   # (1, g, ..., W)

        if y_is_labels:
            lab = y_ref[...]                            # (g, ..., W) int32
            cls = lax.broadcasted_iota(jnp.int32, (num_classes,) + lab.shape, 0)
            onehot = lab[jnp.newaxis] == cls            # bool (C, g, ..., W)
            if has_mask:
                xm = x * m
                ym = onehot.astype(jnp.float32) * m
                tp = jnp.where(onehot, xm, 0.0)
            else:
                xm = x
                ym = onehot.astype(jnp.float32)
                tp = jnp.where(onehot, x, 0.0)
        else:
            y = y_ref[...].astype(jnp.float32)          # dense / soft targets
            if has_mask:
                xm = x * m
                ym = y * m
                tp = xm * y
            else:
                xm = x
                ym = y
                tp = x * y

        sx_ref[...] += _window_sum(xm)
        sy_ref[...] += _window_sum(ym)
        st_ref[...] += _window_sum(tp)

    if has_mask:
        def kernel(x_ref, y_ref, m_ref, sx_ref, sy_ref, st_ref):
            _body(x_ref, y_ref, m_ref, sx_ref, sy_ref, st_ref)
    else:
        def kernel(x_ref, y_ref, sx_ref, sy_ref, st_ref):
            _body(x_ref, y_ref, None, sx_ref, sy_ref, st_ref)
    return kernel


# ---------------------------------------------------------------------------
# Wrapper: free reshapes, grid/BlockSpec construction, tiny epilogue.
# ---------------------------------------------------------------------------
def region_specific_loss(x, y, loss_mask=None, *,
                         num_region_per_axis=(16, 16, 16),
                         apply_nonlin=None, smooth=1e-5,
                         do_bg=False, batch_dice=True,
                         alpha=0.3, beta=0.4,
                         target_block_bytes=512 * 1024):
    dim = len(num_region_per_axis)
    assert dim in (2, 3), "The num of dim must be 2 or 3."
    assert dim == x.ndim - 2, "The region size must match the data's size."
    if not batch_dice:
        # TODO(synk): batch_dice=False path (per-sample Tversky) not implemented.
        raise NotImplementedError("only batch_dice=True is implemented")

    if apply_nonlin is not None:
        x = apply_nonlin(x)
    # NOTE: x stays in its native dtype in HBM; upcast to f32 happens in VMEM.

    B, C = int(x.shape[0]), int(x.shape[1])
    spatial = tuple(int(s) for s in x.shape[2:])
    regions = tuple(int(r) for r in num_region_per_axis)
    windows = []
    for s, r in zip(spatial, regions):
        # TODO(synk): uneven adaptive-pool windows (size % regions != 0) unsupported.
        assert s % r == 0, "spatial size must be divisible by num regions"
        windows.append(s // r)
    windows = tuple(windows)
    K = int(np.prod(windows))

    r1, k1 = regions[0], windows[0]
    Wl = spatial[-1]
    r_last, k_last = regions[-1], windows[-1]
    if dim == 3:
        r2, k2 = regions[1], windows[1]

    # --- target handling (mirror of the torch scatter_ one-hot) -------------
    if y.ndim != x.ndim:
        y = y.reshape(y.shape[0], 1, *y.shape[1:])
    y_is_labels = tuple(y.shape) != tuple(x.shape)
    if y_is_labels:
        y = y.astype(jnp.int32)

    has_mask = loss_mask is not None
    if has_mask:
        m = loss_mask
        if m.ndim != x.ndim:
            m = m.reshape(m.shape[0], 1, *m.shape[1:])

    # --- free (row-major split) reshapes: no HBM copies ---------------------
    yc = 1 if y_is_labels else C
    if dim == 2:
        xr = x.reshape(B, C, r1, k1, Wl)
        yr = y.reshape(B, yc, r1, k1, Wl)
        if has_mask:
            mr = m.reshape(B, 1, r1, k1, Wl)
    else:
        xr = x.reshape(B, C, r1, k1, r2, k2, Wl)
        yr = y.reshape(B, yc, r1, k1, r2, k2, Wl)
        if has_mask:
            mr = m.reshape(B, 1, r1, k1, r2, k2, Wl)

    # --- pick region-rows per block (amortize per-step overhead, fit VMEM) --
    itemsize = jnp.dtype(x.dtype).itemsize
    row_bytes = C * int(np.prod(windows[:-1])) * Wl * itemsize
    g = 1
    for d in range(1, r1 + 1):
        if r1 % d == 0 and d * row_bytes <= target_block_bytes:
            g = d
    n1 = r1 // g

    kernel = _make_kernel(dim=dim, num_classes=C,
                          y_is_labels=y_is_labels, has_mask=has_mask)

    if dim == 2:
        grid = (n1, B)
        x_spec = pl.BlockSpec((None, C, g, k1, Wl), lambda i, b: (b, 0, i, 0, 0))
        if y_is_labels:
            y_spec = pl.BlockSpec((None, None, g, k1, Wl),
                                  lambda i, b: (b, 0, i, 0, 0))
        else:
            y_spec = pl.BlockSpec((None, C, g, k1, Wl),
                                  lambda i, b: (b, 0, i, 0, 0))
        m_spec = pl.BlockSpec((None, None, g, k1, Wl),
                              lambda i, b: (b, 0, i, 0, 0))
        out_full = (n1, C, g, Wl)
        out_spec = pl.BlockSpec((None, C, g, Wl), lambda i, b: (i, 0, 0, 0))
    else:
        grid = (n1, r2, B)
        x_spec = pl.BlockSpec((None, C, g, k1, None, k2, Wl),
                              lambda i, j, b: (b, 0, i, 0, j, 0, 0))
        if y_is_labels:
            y_spec = pl.BlockSpec((None, None, g, k1, None, k2, Wl),
                                  lambda i, j, b: (b, 0, i, 0, j, 0, 0))
        else:
            y_spec = pl.BlockSpec((None, C, g, k1, None, k2, Wl),
                                  lambda i, j, b: (b, 0, i, 0, j, 0, 0))
        m_spec = pl.BlockSpec((None, None, g, k1, None, k2, Wl),
                              lambda i, j, b: (b, 0, i, 0, j, 0, 0))
        out_full = (n1, r2, C, g, Wl)
        out_spec = pl.BlockSpec((None, None, C, g, Wl),
                                lambda i, j, b: (i, j, 0, 0, 0))

    in_specs = [x_spec, y_spec] + ([m_spec] if has_mask else [])
    operands = (xr, yr) + ((mr,) if has_mask else ())
    out_shapes = tuple(jax.ShapeDtypeStruct(out_full, jnp.float32) for _ in range(3))
    out_specs = (out_spec, out_spec, out_spec)

    sx, sy, st = pl.pallas_call(
        kernel,
        out_shape=out_shapes,
        grid_spec=pltpu.PrefetchScalarGridSpec(
            num_scalar_prefetch=0,
            grid=grid,
            in_specs=in_specs,
            out_specs=out_specs,
        ),
        compiler_params=pltpu.CompilerParams(
            dimension_semantics=("parallel",) * (dim - 1) + ("arbitrary",),
            vmem_limit_bytes=32 * 1024 * 1024,
        ),
    )(*operands)

    # --- tiny epilogue on window-row-reduced data (1/(k1[*k2]) of x) ---------
    def _rows(t):
        if dim == 2:
            t = jnp.transpose(t, (0, 2, 1, 3))       # (n1, g, C, W)
            return t.reshape(r1, C, Wl)
        t = jnp.transpose(t, (0, 3, 1, 2, 4))         # (n1, g, r2, C, W)
        return t.reshape(r1, r2, C, Wl)

    def _pool_last(t):
        t = t.reshape(t.shape[:-1] + (r_last, k_last)).sum(-1)
        return t * (1.0 / K)                          # region means

    rx = _pool_last(_rows(sx))      # mean(x*m)      (r1[, r2], C, r_last)
    ry = _pool_last(_rows(sy))      # mean(y*m)
    rtp = _pool_last(_rows(st))     # mean(x*y*m)
    rfp = rx - rtp                  # mean(x*(1-y)*m)
    rfn = ry - rtp                  # mean((1-x)*y*m)

    denom = rfp + rfn + smooth
    a_r = alpha + beta * (rfp + smooth) / denom
    b_r = alpha + beta * (rfn + smooth) / denom
    tv = (rtp + smooth) / (rtp + a_r * rfp + b_r * rfn + smooth)

    region_axes = tuple(ax for ax in range(tv.ndim) if ax != tv.ndim - 2)
    tv = tv.mean(axis=region_axes)                    # (C,)
    if not do_bg:
        tv = tv[1:]
    return -tv.mean()


# ---------------------------------------------------------------------------
# Pure-JAX reference (mirrors the PyTorch forward) for verification.
# ---------------------------------------------------------------------------
def _blocked_view(t, regions):
    B, C = t.shape[0], t.shape[1]
    spatial = t.shape[2:]
    windows = tuple(s // r for s, r in zip(spatial, regions))
    shp = (B, C)
    for r, k in zip(regions, windows):
        shp += (r, k)
    t = t.reshape(shp)
    nd = len(regions)
    perm = (0, 1) + tuple(2 + 2 * i for i in range(nd)) + tuple(3 + 2 * i for i in range(nd))
    t = jnp.transpose(t, perm)
    R = int(np.prod(regions))
    Kw = int(np.prod(windows))
    return t.reshape(B, C, R, Kw)


def _reference_loss(x, y, loss_mask=None, *, num_region_per_axis=(8, 8),
                    apply_nonlin=None, smooth=1e-5, do_bg=False,
                    alpha=0.3, beta=0.4):
    if apply_nonlin is not None:
        x = apply_nonlin(x)
    x = x.astype(jnp.float32)
    B, C = x.shape[0], x.shape[1]
    if y.ndim != x.ndim:
        y = y.reshape(y.shape[0], 1, *y.shape[1:])
    if y.shape == x.shape:
        yoh = y.astype(jnp.float32)
    else:
        yoh = jax.nn.one_hot(y[:, 0].astype(jnp.int32), C, axis=1, dtype=jnp.float32)
    tp, fp, fn = x * yoh, x * (1 - yoh), (1 - x) * yoh
    if loss_mask is not None:
        m = loss_mask
        if m.ndim != x.ndim:
            m = m.reshape(m.shape[0], 1, *m.shape[1:])
        tp, fp, fn = tp * m, fp * m, fn * m

    def pool(t):
        return _blocked_view(t, num_region_per_axis).mean(-1)   # (B, C, R)

    rtp, rfp, rfn = pool(tp).sum(0), pool(fp).sum(0), pool(fn).sum(0)
    a_r = alpha + beta * (rfp + smooth) / (rfp + rfn + smooth)
    b_r = alpha + beta * (rfn + smooth) / (rfp + rfn + smooth)
    tv = (rtp + smooth) / (rtp + a_r * rfp + b_r * rfn + smooth)
    tv = tv.mean(-1)
    if not do_bg:
        tv = tv[1:]
    return -tv.mean()


if __name__ == "__main__":
    key = jax.random.PRNGKey(0)
    keys = jax.random.split(key, 5)

    # ---- 2-D, integer labels, no loss mask (primary optimized path) --------
    B, C, H, W = 2, 4, 32, 32
    regions2d = (8, 8)
    x2 = jax.random.uniform(keys[0], (B, C, H, W), dtype=jnp.float32)
    gt2 = jax.random.randint(keys[1], (B, 1, H, W), 0, C, dtype=jnp.int32)

    out = jax.block_until_ready(
        region_specific_loss(x2, gt2, num_region_per_axis=regions2d))
    ref = jax.block_until_ready(
        _reference_loss(x2, gt2, num_region_per_axis=regions2d))
    np.testing.assert_allclose(np.asarray(out), np.asarray(ref),
                               rtol=1e-5, atol=1e-5)

    # ---- 2-D with a loss mask ----------------------------------------------
    mask2 = (jax.random.uniform(keys[2], (B, 1, H, W)) > 0.3).astype(jnp.float32)
    out_m = jax.block_until_ready(
        region_specific_loss(x2, gt2, mask2, num_region_per_axis=regions2d))
    ref_m = jax.block_until_ready(
        _reference_loss(x2, gt2, mask2, num_region_per_axis=regions2d))
    np.testing.assert_allclose(np.asarray(out_m), np.asarray(ref_m),
                               rtol=1e-5, atol=1e-5)

    # ---- 3-D, integer labels (module default is a 3-D region grid) ----------
    B3, C3, D3, H3, W3 = 2, 3, 16, 16, 16
    regions3d = (4, 4, 4)
    x3 = jax.random.uniform(keys[3], (B3, C3, D3, H3, W3), dtype=jnp.float32)
    gt3 = jax.random.randint(keys[4], (B3, 1, D3, H3, W3), 0, C3, dtype=jnp.int32)

    out3 = jax.block_until_ready(
        region_specific_loss(x3, gt3, num_region_per_axis=regions3d))
    ref3 = jax.block_until_ready(
        _reference_loss(x3, gt3, num_region_per_axis=regions3d))
    np.testing.assert_allclose(np.asarray(out3), np.asarray(ref3),
                               rtol=1e-5, atol=1e-5)

    print("KERNEL_OK")
</pallas_src>

<mosaic_0001>
module attributes {stable_mosaic.version = 11 : i64} {
  func.func @kernel(%arg0: i32, %arg1: i32, %arg2: memref<1x4x8x4x32xf32, #tpu.memory_space<vmem>>, %arg3: memref<1x1x8x4x32xi32, #tpu.memory_space<vmem>>, %arg4: memref<1x4x8x32xf32, #tpu.memory_space<vmem>>, %arg5: memref<1x4x8x32xf32, #tpu.memory_space<vmem>>, %arg6: memref<1x4x8x32xf32, #tpu.memory_space<vmem>>) attributes {dimension_semantics = [#tpu.dimension_semantics<parallel>, #tpu.dimension_semantics<arbitrary>], iteration_bounds = array<i64: 1, 2>, scalar_prefetch = 0 : i64, scratch_operands = 0 : i64, tpu.core_type = #tpu.core_type<tc>, window_params = [{transform_indices = @transform_0, window_bounds = array<i64: 1, 4, 8, 4, 32>}, {transform_indices = @transform_1, window_bounds = array<i64: 1, 1, 8, 4, 32>}, {transform_indices = @transform_2, window_bounds = array<i64: 1, 4, 8, 32>}, {transform_indices = @transform_3, window_bounds = array<i64: 1, 4, 8, 32>}, {transform_indices = @transform_4, window_bounds = array<i64: 1, 4, 8, 32>}]} {
    %c0_i32 = arith.constant 0 : i32
    %0 = arith.cmpi eq, %arg1, %c0_i32 : i32
    %1 = arith.extui %0 : i1 to i32
    %c0_i32_0 = arith.constant 0 : i32
    %2 = arith.cmpi ne, %1, %c0_i32_0 : i32
    scf.if %2 {
      %cst_37 = arith.constant 0.000000e+00 : f32
      %36 = vector.broadcast %cst_37 : f32 to vector<4x8x32xf32>
      %c0_38 = arith.constant 0 : index
      %c0_39 = arith.constant 0 : index
      %c0_40 = arith.constant 0 : index
      %c0_41 = arith.constant 0 : index
      %37 = vector.load %arg4[%c0_38, %c0_39, %c0_40, %c0_41] : memref<1x4x8x32xf32, #tpu.memory_space<vmem>>, vector<1x4x8x32xf32>
      %38 = vector.shape_cast %37 : vector<1x4x8x32xf32> to vector<4x8x32xf32>
      %39 = vector.shape_cast %36 : vector<4x8x32xf32> to vector<1x4x8x32xf32>
      tpu.vector_store %arg4[%c0_38, %c0_39, %c0_40, %c0_41], %39 {strides = array<i32>} : memref<1x4x8x32xf32, #tpu.memory_space<vmem>>, vector<1x4x8x32xf32>,
      %cst_42 = arith.constant 0.000000e+00 : f32
      %40 = vector.broadcast %cst_42 : f32 to vector<4x8x32xf32>
      %c0_43 = arith.constant 0 : index
      %c0_44 = arith.constant 0 : index
      %c0_45 = arith.constant 0 : index
      %c0_46 = arith.constant 0 : index
      %41 = vector.load %arg5[%c0_43, %c0_44, %c0_45, %c0_46] : memref<1x4x8x32xf32, #tpu.memory_space<vmem>>, vector<1x4x8x32xf32>
      %42 = vector.shape_cast %41 : vector<1x4x8x32xf32> to vector<4x8x32xf32>
      %43 = vector.shape_cast %40 : vector<4x8x32xf32> to vector<1x4x8x32xf32>
      tpu.vector_store %arg5[%c0_43, %c0_44, %c0_45, %c0_46], %43 {strides = array<i32>} : memref<1x4x8x32xf32, #tpu.memory_space<vmem>>, vector<1x4x8x32xf32>,
      %cst_47 = arith.constant 0.000000e+00 : f32
      %44 = vector.broadcast %cst_47 : f32 to vector<4x8x32xf32>
      %c0_48 = arith.constant 0 : index
      %c0_49 = arith.constant 0 : index
      %c0_50 = arith.constant 0 : index
      %c0_51 = arith.constant 0 : index
      %45 = vector.load %arg6[%c0_48, %c0_49, %c0_50, %c0_51] : memref<1x4x8x32xf32, #tpu.memory_space<vmem>>, vector<1x4x8x32xf32>
      %46 = vector.shape_cast %45 : vector<1x4x8x32xf32> to vector<4x8x32xf32>
      %47 = vector.shape_cast %44 : vector<4x8x32xf32> to vector<1x4x8x32xf32>
      tpu.vector_store %arg6[%c0_48, %c0_49, %c0_50, %c0_51], %47 {strides = array<i32>} : memref<1x4x8x32xf32, #tpu.memory_space<vmem>>, vector<1x4x8x32xf32>,
    } else {
    }
    %c0 = arith.constant 0 : index
    %c0_1 = arith.constant 0 : index
    %c0_2 = arith.constant 0 : index
    %c0_3 = arith.constant 0 : index
    %c0_4 = arith.constant 0 : index
    %3 = vector.load %arg2[%c0, %c0_1, %c0_2, %c0_3, %c0_4] : memref<1x4x8x4x32xf32, #tpu.memory_space<vmem>>, vector<1x4x8x4x32xf32>
    %4 = vector.shape_cast %3 : vector<1x4x8x4x32xf32> to vector<4x8x4x32xf32>
    %c0_5 = arith.constant 0 : index
    %c0_6 = arith.constant 0 : index
    %c0_7 = arith.constant 0 : index
    %c0_8 = arith.constant 0 : index
    %c0_9 = arith.constant 0 : index
    %5 = vector.load %arg3[%c0_5, %c0_6, %c0_7, %c0_8, %c0_9] : memref<1x1x8x4x32xi32, #tpu.memory_space<vmem>>, vector<1x1x8x4x32xi32>
    %6 = vector.shape_cast %5 : vector<1x1x8x4x32xi32> to vector<8x4x32xi32>
    %7 = tpu.iota {dimensions = array<i32: 0>} : vector<4x8x4x32xi32>
    %8 = vector.shape_cast %6 : vector<8x4x32xi32> to vector<1x8x4x32xi32>
    %9 = vector.broadcast %8 : vector<1x8x4x32xi32> to vector<4x8x4x32xi32>
    %10 = arith.cmpi eq, %9, %7 : vector<4x8x4x32xi32>
    %11 = arith.extui %10 : vector<4x8x4x32xi1> to vector<4x8x4x32xi32>
    %12 = arith.sitofp %11 : vector<4x8x4x32xi32> to vector<4x8x4x32xf32>
    %cst = arith.constant 0.000000e+00 : f32
    %13 = vector.broadcast %cst : f32 to vector<4x8x4x32xf32>
    %14 = arith.select %10, %4, %13 : vector<4x8x4x32xi1>, vector<4x8x4x32xf32>
    %c0_10 = arith.constant 0 : index
    %c0_11 = arith.constant 0 : index
    %c0_12 = arith.constant 0 : index
    %c0_13 = arith.constant 0 : index
    %15 = vector.load %arg4[%c0_10, %c0_11, %c0_12, %c0_13] : memref<1x4x8x32xf32, #tpu.memory_space<vmem>>, vector<1x4x8x32xf32>
    %16 = vector.shape_cast %15 : vector<1x4x8x32xf32> to vector<4x8x32xf32>
    %cst_14 = arith.constant dense<0.000000e+00> : vector<4x8x32xf32>
    %17 = vector.multi_reduction <add>, %4, %cst_14 [2] : vector<4x8x4x32xf32> to vector<4x8x32xf32>
    %18 = arith.addf %16, %17 : vector<4x8x32xf32>
    %c0_15 = arith.constant 0 : index
    %c0_16 = arith.constant 0 : index
    %c0_17 = arith.constant 0 : index
    %c0_18 = arith.constant 0 : index
    %19 = vector.load %arg4[%c0_15, %c0_16, %c0_17, %c0_18] : memref<1x4x8x32xf32, #tpu.memory_space<vmem>>, vector<1x4x8x32xf32>
    %20 = vector.shape_cast %19 : vector<1x4x8x32xf32> to vector<4x8x32xf32>
    %21 = vector.shape_cast %18 : vector<4x8x32xf32> to vector<1x4x8x32xf32>
    tpu.vector_store %arg4[%c0_15, %c0_16, %c0_17, %c0_18], %21 {strides = array<i32>} : memref<1x4x8x32xf32, #tpu.memory_space<vmem>>, vector<1x4x8x32xf32>,
    %c0_19 = arith.constant 0 : index
    %c0_20 = arith.constant 0 : index
    %c0_21 = arith.constant 0 : index
    %c0_22 = arith.constant 0 : index
    %22 = vector.load %arg5[%c0_19, %c0_20, %c0_21, %c0_22] : memref<1x4x8x32xf32, #tpu.memory_space<vmem>>, vector<1x4x8x32xf32>
    %23 = vector.shape_cast %22 : vector<1x4x8x32xf32> to vector<4x8x32xf32>
    %cst_23 = arith.constant dense<0.000000e+00> : vector<4x8x32xf32>
    %24 = vector.multi_reduction <add>, %12, %cst_23 [2] : vector<4x8x4x32xf32> to vector<4x8x32xf32>
    %25 = arith.addf %23, %24 : vector<4x8x32xf32>
    %c0_24 = arith.constant 0 : index
    %c0_25 = arith.constant 0 : index
    %c0_26 = arith.constant 0 : index
    %c0_27 = arith.constant 0 : index
    %26 = vector.load %arg5[%c0_24, %c0_25, %c0_26, %c0_27] : memref<1x4x8x32xf32, #tpu.memory_space<vmem>>, vector<1x4x8x32xf32>
    %27 = vector.shape_cast %26 : vector<1x4x8x32xf32> to vector<4x8x32xf32>
    %28 = vector.shape_cast %25 : vector<4x8x32xf32> to vector<1x4x8x32xf32>
    tpu.vector_store %arg5[%c0_24, %c0_25, %c0_26, %c0_27], %28 {strides = array<i32>} : memref<1x4x8x32xf32, #tpu.memory_space<vmem>>, vector<1x4x8x32xf32>,
    %c0_28 = arith.constant 0 : index
    %c0_29 = arith.constant 0 : index
    %c0_30 = arith.constant 0 : index
    %c0_31 = arith.constant 0 : index
    %29 = vector.load %arg6[%c0_28, %c0_29, %c0_30, %c0_31] : memref<1x4x8x32xf32, #tpu.memory_space<vmem>>, vector<1x4x8x32xf32>
    %30 = vector.shape_cast %29 : vector<1x4x8x32xf32> to vector<4x8x32xf32>
    %cst_32 = arith.constant dense<0.000000e+00> : vector<4x8x32xf32>
    %31 = vector.multi_reduction <add>, %14, %cst_32 [2] : vector<4x8x4x32xf32> to vector<4x8x32xf32>
    %32 = arith.addf %30, %31 : vector<4x8x32xf32>
    %c0_33 = arith.constant 0 : index
    %c0_34 = arith.constant 0 : index
    %c0_35 = arith.constant 0 : index
    %c0_36 = arith.constant 0 : index
    %33 = vector.load %arg6[%c0_33, %c0_34, %c0_35, %c0_36] : memref<1x4x8x32xf32, #tpu.memory_space<vmem>>, vector<1x4x8x32xf32>
    %34 = vector.shape_cast %33 : vector<1x4x8x32xf32> to vector<4x8x32xf32>
    %35 = vector.shape_cast %32 : vector<4x8x32xf32> to vector<1x4x8x32xf32>
    tpu.vector_store %arg6[%c0_33, %c0_34, %c0_35, %c0_36], %35 {strides = array<i32>} : memref<1x4x8x32xf32, #tpu.memory_space<vmem>>, vector<1x4x8x32xf32>,
    return
  }
  func.func @transform_0(%arg0: i32, %arg1: i32) -> (i32, i32, i32, i32, i32) {
    %c0_i32 = arith.constant 0 : i32
    %c0_i32_0 = arith.constant 0 : i32
    %c0_i32_1 = arith.constant 0 : i32
    %c0_i32_2 = arith.constant 0 : i32
    return %arg1, %c0_i32, %arg0, %c0_i32_0, %c0_i32_1 : i32, i32, i32, i32, i32
  }
  func.func @transform_1(%arg0: i32, %arg1: i32) -> (i32, i32, i32, i32, i32) {
    %c0_i32 = arith.constant 0 : i32
    %c0_i32_0 = arith.constant 0 : i32
    %c0_i32_1 = arith.constant 0 : i32
    %c0_i32_2 = arith.constant 0 : i32
    return %arg1, %c0_i32, %arg0, %c0_i32_0, %c0_i32_1 : i32, i32, i32, i32, i32
  }
  func.func @transform_2(%arg0: i32, %arg1: i32) -> (i32, i32, i32, i32) {
    %c0_i32 = arith.constant 0 : i32
    %c0_i32_0 = arith.constant 0 : i32
    %c0_i32_1 = arith.constant 0 : i32
    %c0_i32_2 = arith.constant 0 : i32
    return %arg0, %c0_i32, %c0_i32_0, %c0_i32_1 : i32, i32, i32, i32
  }
  func.func @transform_3(%arg0: i32, %arg1: i32) -> (i32, i32, i32, i32) {
    %c0_i32 = arith.constant 0 : i32
    %c0_i32_0 = arith.constant 0 : i32
    %c0_i32_1 = arith.constant 0 : i32
    %c0_i32_2 = arith.constant 0 : i32
    return %arg0, %c0_i32, %c0_i32_0, %c0_i32_1 : i32, i32, i32, i32
  }
  func.func @transform_4(%arg0: i32, %arg1: i32) -> (i32, i32, i32, i32) {
    %c0_i32 = arith.constant 0 : i32
    %c0_i32_0 = arith.constant 0 : i32
    %c0_i32_1 = arith.constant 0 : i32
    %c0_i32_2 = arith.constant 0 : i32
    return %arg0, %c0_i32, %c0_i32_0, %c0_i32_1 : i32, i32, i32, i32
  }
}

</mosaic_0001>

<bundles_post_ra>
// kernel: tpu_custom_call.1
= control target key start
LH: loop header
LB: loop body
LE: loop exit
PB: predicated region body
PF: predicated region fallthrough
CT: control target
= control target key end

     0   :  { %10 = vsyncpa [#allocation3], 0  ;;  %s2634_s0 = inlined_call_operand.hbm [shape: f32[2,4,8,4,32], index: 0, kind: input, shape index: {}]   ;;  %s2635_s1 = inlined_call_operand.hbm [shape: s32[2,1,8,4,32], index: 1, kind: input, shape index: {}]   ;;  %s2636_s2 = inlined_call_operand.hbm [shape: f32[1,4,8,32], index: 2, kind: output, shape index: {0}]   ;;  %s2637_s3 = inlined_call_operand.hbm [shape: f32[1,4,8,32], index: 3, kind: output, shape index: {1}]   ;;  %s2638_s4 = inlined_call_operand.hbm [shape: f32[1,4,8,32], index: 4, kind: output, shape index: {2}]  }
   0x1   :  { %12 = vsyncpa [#allocation3 + $0x1], 0 }
   0x2   :  { %13 = vsyncpa [#allocation6], 0 }
   0x3   :  { %15 = vsyncpa [#allocation6 + $0x1], 0 }
   0x4   :  { %16 = vsyncpa [#allocation4], 0 }
   0x5   :  { %17 = vsyncpa [#allocation9], 0  ;;  %s1900_s15 = smov 0   ;;  %s1902_s16 = smov 0  }
   0x6   :  { %s1904_s17 = smov 0   ;;  %s1906_s18 = smov 0  }
   0x7   :  { %s1908_s19 = smov 0   ;;  %s1910_s20 = smov 0  }
   0x8 LB: > { %s1530_s21 = sadd.s32 4294967295, %s1862_s20   ;;  %s32_s22 = sadd.s32 1, %s1858_s19  ;;  %s1862_s20 = sphi %s1910_s20, %s23_s20   ;;  %s1858_s19 = sphi %s1908_s19, %s2718_s19   ;;  %s1854_s18 = sphi %s1906_s18, %s2717_s18   ;;  %s1850_s17 = sphi %s1904_s17, %s2716_s17   ;;  %s1846_s16 = sphi %s1902_s16, %s2715_s16   ;;  %s1842_s15 = sphi %s1900_s15, %s2714_s15  }
   0x9   : > { %p33_p0 = scmp.ge.s32.totalorder %s32_s22, 2  ;;  %s44_s23 = sadd.s32 1, %s1850_s17 }
   0xa   : > { %p51_p1 = scmp.ne.s32.totalorder %s1850_s17, %s1846_s16  ;;  %p52_p2 = scmp.eq.s32.totalorder %s1862_s20, 0 }
   0xb   : > { %s2720_s22 = smov (%p33_p0, %s32_s22), 0  ;;  %p57_p4 = scmp.ne.s32.totalorder %s1846_s16, %s1842_s15 }
   0xc   : > { %p1936_p3 = por %p52_p2, %p51_p1  ;;  %s39_s25 = ssub.s32 %s1858_s19, %s2720_s22 }
   0xd   : > { %p58_p5 = scmp.eq.s32.totalorder %s1530_s21, 0  ;;  %p42_p6 = scmp.eq.s32.totalorder %s39_s25, 0 }
   0xe   : > { %p1608_p8 = scmp.lt.s32.totalorder %s1862_s20, 2  ;;  %s1954_s28 = sand.u32 1, %s1850_s17  }
   0xf   : > { %p1945_p7 = por %p58_p5, %p57_p4  ;;  %s1583_s29 = sshll.u32 %s1858_s19, 11 }
  0x10   : > { %s1951_s27 = scalar_select %p42_p6, %s1850_s17, %s44_s23  }
  0x11   : > { %s1533_s30 = sshll.u32 %s1954_s28, 7  ;;  %s199_s7 = scalar_lea.hbm %s2634_s0, %s1583_s29 }
  0x12   : > { %s191_s8 = scalar_lea.vmem [#allocation2], %s1533_s30  ;;  %p1963_p9 = pnand %p1608_p8, %p1936_p3 }
  0x13   : > { %s200_s9 = sshll.u32 %s191_s8, 4  ;;  %s188_s11 = scalar_lea.sflag [#allocation3], %s1954_s28  ;;  %s201_s9 = int_to_ptr.vmem [resolvable:$true] %s200_s9 }
  0x14   : > { %p1674_p10 = pneg %p1963_p9  ;;  %s1685_s12 = scalar_lea.vmem %s201_s9, 2048 }
  0x15   : > { %p1686_p11 = scmp.ne.s32.totalorder %s201_s9, %s1685_s12  ;;  %s1864_s13 = smov [#allocation2]  }
  0x16   : > { %s1690_s14 = sshll.u32 %s1864_s13, 4  ;;  %s1691_s14 = int_to_ptr.vmem [resolvable:$false] %s1690_s14 }
  0x17   : > { %p1688_p12 = pnand %p1686_p11, %p1674_p10  ;;  %s1692_s15 = scalar_lea.vmem %s1691_s14, 4096 }
  0x18   : > { %p1693_p0 = scmp.lt.s32.totalorder %s201_s9, %s1691_s14  ;;  %p1694_p1 = scmp.lt.s32.totalorder %s1692_s15, %s1685_s12 }
  0x19   : > { %p1689_p13 = pneg %p1688_p12 }
  0x1a   : > { %p1695_p2 = por %p1694_p1, %p1693_p0 }
  0x1c   : > { %p1696_p3 = pnand %p1695_p2, %p1689_p13 }
  0x1e   : > { %1699 = shalt.err (!%p1696_p3)
}
  0x1f   : > { %s1865_s23 = smov 64   ;;  %s1866_s24 = smov 4  }
  0x20   : > { %1604 = dma.hbm_to_vmem [thread:$0]  (!%p1963_p9), %s199_s7, 2048, %s201_s9, %s188_s11, %s1865_s23, %s1865_s23, %s1866_s24  }
  0x21   : > { %p1539_p4 = scmp.ge.s32.totalorder %s1862_s20, 1  ;;  %p231_p5 = scmp.lt.s32.totalorder %s1862_s20, 3 }
  0x22   : > { %s1536_s25 = sshll.u32 %s1954_s28, 5  ;;  %s1584_s30 = sshll.u32 %s1858_s19, 9 }
  0x23   : > { %p1981_p6 = pnand %p1539_p4, %p231_p5  ;;  %s214_s5 = scalar_lea.vmem [#allocation5], %s1536_s25 }
  0x24   : > { %s223_s6 = sshll.u32 %s214_s5, 4  ;;  %s222_s13 = scalar_lea.hbm %s2635_s1, %s1584_s30  ;;  %s224_s6 = int_to_ptr.vmem [resolvable:$true] %s223_s6 }
  0x25   : > { %s211_s14 = scalar_lea.sflag [#allocation6], %s1954_s28  ;;  %s1713_s15 = scalar_lea.vmem %s224_s6, 512 }
  0x26   : > { %p1714_p8 = scmp.ne.s32.totalorder %s224_s6, %s1713_s15  ;;  %s1867_s7 = smov [#allocation5]  }
  0x27   : > { %s1718_s9 = sshll.u32 %s1867_s7, 4  ;;  %s1719_s9 = int_to_ptr.vmem [resolvable:$false] %s1718_s9 }
  0x28   : > { %p1716_p11 = pnand %p1714_p8, %p1674_p10  ;;  %s1720_s11 = scalar_lea.vmem %s1719_s9, 1024 }
  0x29   : > { %p1721_p13 = scmp.lt.s32.totalorder %s224_s6, %s1719_s9  ;;  %p1722_p0 = scmp.lt.s32.totalorder %s1720_s11, %s1713_s15 }
  0x2a   : > { %p1717_p12 = pneg %p1716_p11 }
  0x2b   : > { %p1723_p1 = por %p1722_p0, %p1721_p13 }
  0x2d   : > { %p1724_p2 = pnand %p1723_p1, %p1717_p12 }
  0x2f   : > { %1727 = shalt.err (!%p1724_p2)
}
  0x30   : > { %1607 = dma.hbm_to_vmem [thread:$0]  (!%p1963_p9), %s222_s13, 512, %s224_s6, %s211_s14, %s1865_s23, %s1865_s23, %s1866_s24  }
  0x31   : > { %235 = sbr.rel (%p1981_p6) target bundleno = 320 (0x140), region = 28 }
  0x36   : > { %s237_s28 = sand.u32 1, %s1846_s16  }
  0x37   : > { %s1540_s25 = sshll.u32 %s237_s28, 7  ;;  %s238_s30 = scalar_lea.sflag [#allocation3], %s237_s28 }
  0x38   : > { %s2001_s5 = scalar_lea.vmem [#allocation2], %s1540_s25 }
  0x39   : > { %1825 = dma.done.wait (%p1945_p7), %s238_s30, 2048  }
  0x3a   : > { %1827 = vsyncadd (%p1945_p7), %s238_s30, 4294965248  ;;  %s1541_s10 = sshll.u32 %s237_s28, 5  ;;  %s247_s8 = scalar_lea.sflag [#allocation6], %s237_s28 }
  0x3b   : > { %s250_s12 = scalar_lea.vmem [#allocation5], %s1541_s10 }
  0x3c   : > { %1829 = dma.done.wait (%p1945_p7), %s247_s8, 512  }
  0x3d   : > { %1831 = vsyncadd (%p1945_p7), %s247_s8, 4294966784  ;;  %p1542_p9 = scmp.ne.s32.totalorder %s1854_s18, 0 }
  0x3f   : > { %280 = sbr.rel (%p1542_p9) target bundleno = 75 (0x4b), region = 40 }
  0x44   : > { %vm281_vm0 = vcmask 261120   ;;  %v1868_v0 = vmov 0.0  }
  0x45   : > { %282 = vst.msk [vmem:[#allocation7] sm:$0xff] %vm281_vm0, %v1868_v0  ;;  %283 = vst.msk [vmem:[#allocation7 + $0x8] sm:$0xff] %vm281_vm0, %v1868_v0 }
  0x46   : > { %284 = vst.msk [vmem:[#allocation7 + $0x10] sm:$0xff] %vm281_vm0, %v1868_v0  ;;  %285 = vst.msk [vmem:[#allocation7 + $0x18] sm:$0xff] %vm281_vm0, %v1868_v0 }
  0x47   : > { %286 = vst.msk [vmem:[#allocation8] sm:$0xff] %vm281_vm0, %v1868_v0  ;;  %287 = vst.msk [vmem:[#allocation8 + $0x8] sm:$0xff] %vm281_vm0, %v1868_v0 }
  0x48   : > { %288 = vst.msk [vmem:[#allocation8 + $0x10] sm:$0xff] %vm281_vm0, %v1868_v0  ;;  %289 = vst.msk [vmem:[#allocation8 + $0x18] sm:$0xff] %vm281_vm0, %v1868_v0 }
  0x49   : > { %290 = vst.msk [vmem:[#allocation10] sm:$0xff] %vm281_vm0, %v1868_v0  ;;  %291 = vst.msk [vmem:[#allocation10 + $0x8] sm:$0xff] %vm281_vm0, %v1868_v0 }
  0x4a   : > { %292 = vst.msk [vmem:[#allocation10 + $0x10] sm:$0xff] %vm281_vm0, %v1868_v0  ;;  %293 = vst.msk [vmem:[#allocation10 + $0x18] sm:$0xff] %vm281_vm0, %v1868_v0 }
  0x4b PF: > { %v2012_v1 = vld [vmem:[%s250_s12] sm:$0xf]  ;;  %v2014_v2 = vld [vmem:[%s250_s12 + $0x4] sm:$0xf]  ;;  %v2016_v3 = vld [vmem:[%s250_s12 + $0x8] sm:$0xf] }
  0x4c   : > { %v2018_v4 = vld [vmem:[%s250_s12 + $0xc] sm:$0xf]  ;;  %v2020_v5 = vld [vmem:[%s250_s12 + $0x10] sm:$0xf]  ;;  %v2022_v6 = vld [vmem:[%s250_s12 + $0x14] sm:$0xf] }
  0x4d   : > { %v2024_v7 = vld [vmem:[%s250_s12 + $0x18] sm:$0xf]  ;;  %v2026_v8 = vld [vmem:[%s250_s12 + $0x1c] sm:$0xf]  ;;  %vm2646_vm1 = vcmp.eq.s32.totalorder %v2012_v1, 0  ;;  %vm2645_vm2 = vcmp.eq.s32.totalorder %v2014_v2, 0 }
  0x4e   : > { %vm2644_vm3 = vcmp.eq.s32.totalorder %v2016_v3, 0  ;;  %vm2643_vm4 = vcmp.eq.s32.totalorder %v2018_v4, 0  ;;  %vm2642_vm5 = vcmp.eq.s32.totalorder %v2020_v5, 0  ;;  %vm2641_vm6 = vcmp.eq.s32.totalorder %v2022_v6, 0  ;;  %p2278_p7 = scmp.eq.s32.totalorder %s1530_s21, 1  ;;  %s1870_s26 = smov [#allocation8]  }
  0x4f   : > { %vm2640_vm7 = vcmp.eq.s32.totalorder %v2024_v7, 0  ;;  %vm2639_vm8 = vcmp.eq.s32.totalorder %v2026_v8, 0  ;;  %vm466_vm9 = vcmask 257024   ;;  %v1869_v9 = vmov 0.0   ;;  %s1396_s23 = sshll.u32 %s1870_s26, 4  ;;  %s1397_s23 = int_to_ptr.vmem [resolvable:$true] %s1396_s23 }
  0x50   : > { %v1543_v10 = vsel %vm2646_vm1, 1.0, %v1869_v9  ;;  %v1544_v11 = vsel %vm2645_vm2, 1.0, %v1869_v9  ;;  %v1545_v12 = vsel %vm2644_vm3, 1.0, %v1869_v9  ;;  %v1546_v13 = vsel %vm2643_vm4, 1.0, %v1869_v9  ;;  %s1728_s21 = scalar_lea.vmem %s1397_s23, 512  ;;  %p1735_p5 = scmp.lt.s32.totalorder %s1397_s23, %s1397_s23 }
  0x51   : > { %v1547_v14 = vsel %vm2642_vm5, 1.0, %v1869_v9  ;;  %v1548_v15 = vsel %vm2641_vm6, 1.0, %v1869_v9  ;;  %v1549_v16 = vsel %vm2640_vm7, 1.0, %v1869_v9  ;;  %v1550_v17 = vsel %vm2639_vm8, 1.0, %v1869_v9  ;;  %p1729_p10 = scmp.ne.s32.totalorder %s1397_s23, %s1728_s21  ;;  %p1736_p6 = scmp.lt.s32.totalorder %s1728_s21, %s1728_s21 }
  0x52   : > { %v775_v18 = vsel %vm466_vm9, %v1543_v10, 0.0  ;;  %v782_v19 = vsel %vm466_vm9, %v1544_v11, 0.0  ;;  %v789_v20 = vsel %vm466_vm9, %v1545_v12, 0.0  ;;  %v796_v21 = vsel %vm466_vm9, %v1546_v13, 0.0 }
  0x53   : > { %v776_v22 = vrot.slane %v775_v18, 4  ;;  %v783_v23 = vrot.slane %v782_v19, 4  ;;  %v790_v24 = vrot.slane %v789_v20, 4  ;;  %v797_v25 = vrot.slane %v796_v21, 4  ;;  %p1730_p3 = pnand %p1729_p10, %p2278_p7  ;;  %p1737_p8 = por %p1736_p6, %p1735_p5 }
  0x54   : > { %vm2647_vm10 = vcmask 1041409   ;;  %v803_v26 = vsel %vm466_vm9, %v1547_v14, 0.0  ;;  %v810_v27 = vsel %vm466_vm9, %v1548_v15, 0.0  ;;  %v817_v28 = vsel %vm466_vm9, %v1549_v16, 0.0 }
  0x55   : > { %v824_v29 = vsel %vm466_vm9, %v1550_v17, 0.0  ;;  %v777_v30 = vadd.f32 %v776_v22, %v775_v18  ;;  %v784_v31 = vadd.f32 %v783_v23, %v782_v19  ;;  %v791_v32 = vadd.f32 %v790_v24, %v789_v20  ;;  %p1731_p4 = pneg %p1730_p3 }
  0x56   : > { %v798_v33 = vadd.f32 %v797_v25, %v796_v21  ;;  %vm725_vm11 = vcmask 1042434   ;;  %v804_v34 = vrot.slane %v803_v26, 4  ;;  %v811_v35 = vrot.slane %v810_v27, 4 }
  0x57   : > { %v818_v36 = vrot.slane %v817_v28, 4  ;;  %v825_v37 = vrot.slane %v824_v29, 4  ;;  %vm727_vm12 = vcmask 1043459   ;;  %v778_v38 = vrot.slane %v777_v30, 2  ;;  %p1738_p11 = pnand %p1737_p8, %p1731_p4 }
  0x58   : > { %v785_v39 = vrot.slane %v784_v31, 2  ;;  %v792_v40 = vrot.slane %v791_v32, 2  ;;  %v799_v41 = vrot.slane %v798_v33, 2  ;;  %vm729_vm13 = vcmask 1044484  }
  0x59   : > { %v805_v42 = vadd.f32 %v804_v34, %v803_v26  ;;  %v812_v43 = vadd.f32 %v811_v35, %v810_v27  ;;  %v819_v44 = vadd.f32 %v818_v36, %v817_v28  ;;  %v826_v45 = vadd.f32 %v825_v37, %v824_v29  ;;  %v771_v27 = vld [vmem:[#allocation8] sm:$0xff] }
  0x5a   : > { %vm731_vm14 = vcmask 1045509   ;;  %v779_v46 = vadd.f32 %v778_v38, %v777_v30  ;;  %v786_v47 = vadd.f32 %v785_v39, %v784_v31  ;;  %v793_v48 = vadd.f32 %v792_v40, %v791_v32 }
  0x5b   : > { %v800_v49 = vadd.f32 %v799_v41, %v798_v33  ;;  %vm733_vm15 = vcmask 1046534   ;;  %v806_v50 = vrot.slane %v805_v42, 2  ;;  %v813_v51 = vrot.slane %v812_v43, 2 }
  0x5c   : > { %v820_v52 = vrot.slane %v819_v44, 2  ;;  %v827_v53 = vrot.slane %v826_v45, 2  ;;  %vm735_vm0 = vcmask 1047559   ;;  %v780_v54 = vrot.slane %v779_v46, 1 }
  0x5d   : > { %v787_v55 = vrot.slane %v786_v47, 1  ;;  %v794_v56 = vrot.slane %v793_v48, 1  ;;  %v801_v57 = vrot.slane %v800_v49, 1  ;;  %v807_v58 = vadd.f32 %v806_v50, %v805_v42 }
  0x5e   : > { %v814_v59 = vadd.f32 %v813_v51, %v812_v43  ;;  %v821_v60 = vadd.f32 %v820_v52, %v819_v44  ;;  %v828_v61 = vadd.f32 %v827_v53, %v826_v45  ;;  %v781_v62 = vadd.f32 %v780_v54, %v779_v46 }
  0x5f   : > { %v788_v63 = vadd.f32 %v787_v55, %v786_v47  ;;  %v795_v0 = vadd.f32 %v794_v56, %v793_v48  ;;  %v802_v10 = vadd.f32 %v801_v57, %v800_v49  ;;  %vm766_vm8 = vcmask 261120  }
  0x60   : > { %v808_v11 = vrot.slane %v807_v58, 1  ;;  %v815_v12 = vrot.slane %v814_v59, 1  ;;  %v822_v13 = vrot.slane %v821_v60, 1  ;;  %v829_v14 = vrot.slane %v828_v61, 1 }
  0x61   : > { %v1031_v15 = vsel %vm2647_vm10, %v788_v63, %v781_v62  ;;  %vm2655_vm7 = vcmp.eq.s32.totalorder %v2012_v1, 1  ;;  %vm2654_vm6 = vcmp.eq.s32.totalorder %v2014_v2, 1  ;;  %vm2653_vm5 = vcmp.eq.s32.totalorder %v2016_v3, 1 }
  0x62   : > { %v809_v16 = vadd.f32 %v808_v11, %v807_v58  ;;  %v816_v17 = vadd.f32 %v815_v12, %v814_v59  ;;  %v823_v18 = vadd.f32 %v822_v13, %v821_v60  ;;  %v830_v19 = vadd.f32 %v829_v14, %v828_v61 }
  0x63   : > { %v1032_v20 = vsel %vm725_vm11, %v795_v0, %v1031_v15  ;;  %vm2652_vm4 = vcmp.eq.s32.totalorder %v2018_v4, 1  ;;  %vm2651_vm3 = vcmp.eq.s32.totalorder %v2020_v5, 1  ;;  %vm2650_vm2 = vcmp.eq.s32.totalorder %v2022_v6, 1 }
  0x64   : > { %v1033_v21 = vsel %vm727_vm12, %v802_v10, %v1032_v20  ;;  %vm2649_vm1 = vcmp.eq.s32.totalorder %v2024_v7, 1  ;;  %vm2648_vm10 = vcmp.eq.s32.totalorder %v2026_v8, 1  ;;  %v1551_v22 = vsel %vm2655_vm7, 1.0, %v1869_v9 }
  0x65   : > { %v1034_v23 = vsel %vm729_vm13, %v809_v16, %v1033_v21  ;;  %v1552_v24 = vsel %vm2654_vm6, 1.0, %v1869_v9  ;;  %v1553_v25 = vsel %vm2653_vm5, 1.0, %v1869_v9  ;;  %v1554_v26 = vsel %vm2652_vm4, 1.0, %v1869_v9 }
  0x66   : > { %v1035_v28 = vsel %vm731_vm14, %v816_v17, %v1034_v23  ;;  %v1555_v29 = vsel %vm2651_vm3, 1.0, %v1869_v9  ;;  %v1556_v30 = vsel %vm2650_vm2, 1.0, %v1869_v9  ;;  %v1557_v31 = vsel %vm2649_vm1, 1.0, %v1869_v9 }
  0x67   : > { %v1036_v32 = vsel %vm733_vm15, %v823_v18, %v1035_v28  ;;  %v1558_v33 = vsel %vm2648_vm10, 1.0, %v1869_v9  ;;  %v831_v34 = vsel %vm466_vm9, %v1551_v22, 0.0  ;;  %v838_v35 = vsel %vm466_vm9, %v1552_v24, 0.0 }
  0x68   : > { %v1037_v36 = vsel %vm735_vm0, %v830_v19, %v1036_v32  ;;  %v832_v37 = vrot.slane %v831_v34, 4  ;;  %v839_v38 = vrot.slane %v838_v35, 4  ;;  %v845_v39 = vsel %vm466_vm9, %v1553_v25, 0.0 }
  0x69   : > { %v1063_v40 = vadd.f32 %v1037_v36, %v771_v27  ;;  %v846_v41 = vrot.slane %v845_v39, 4  ;;  %v852_v42 = vsel %vm466_vm9, %v1554_v26, 0.0  ;;  %v859_v43 = vsel %vm466_vm9, %v1555_v29, 0.0 }
  0x6a   : > { %v833_v44 = vadd.f32 %v832_v37, %v831_v34  ;;  %v840_v45 = vadd.f32 %v839_v38, %v838_v35  ;;  %v853_v46 = vrot.slane %v852_v42, 4  ;;  %v860_v47 = vrot.slane %v859_v43, 4 }
  0x6b   : > { %1067 = vst.msk [vmem:[#allocation8] sm:$0xff] %vm766_vm8, %v1063_v40  ;;  %v847_v48 = vadd.f32 %v846_v41, %v845_v39  ;;  %v866_v49 = vsel %vm466_vm9, %v1556_v30, 0.0  ;;  %v873_v50 = vsel %vm466_vm9, %v1557_v31, 0.0  ;;  %v880_v51 = vsel %vm466_vm9, %v1558_v33, 0.0  ;;  %v772_v41 = vld [vmem:[#allocation8 + $0x8] sm:$0xff] }
  0x6c   : > { %v834_v52 = vrot.slane %v833_v44, 2  ;;  %v841_v53 = vrot.slane %v840_v45, 2  ;;  %v854_v54 = vadd.f32 %v853_v46, %v852_v42  ;;  %v861_v55 = vadd.f32 %v860_v47, %v859_v43 }
  0x6d   : > { %v848_v56 = vrot.slane %v847_v48, 2  ;;  %v867_v57 = vrot.slane %v866_v49, 4  ;;  %v874_v58 = vrot.slane %v873_v50, 4  ;;  %v881_v59 = vrot.slane %v880_v51, 4 }
  0x6e   : > { %v835_v60 = vadd.f32 %v834_v52, %v833_v44  ;;  %v842_v61 = vadd.f32 %v841_v53, %v840_v45  ;;  %v855_v62 = vrot.slane %v854_v54, 2  ;;  %v862_v63 = vrot.slane %v861_v55, 2 }
  0x6f   : > { %v849_v0 = vadd.f32 %v848_v56, %v847_v48  ;;  %v868_v10 = vadd.f32 %v867_v57, %v866_v49  ;;  %v875_v11 = vadd.f32 %v874_v58, %v873_v50  ;;  %v882_v12 = vadd.f32 %v881_v59, %v880_v51 }
  0x70   : > { %v836_v13 = vrot.slane %v835_v60, 1  ;;  %v843_v14 = vrot.slane %v842_v61, 1  ;;  %v856_v15 = vadd.f32 %v855_v62, %v854_v54  ;;  %v863_v16 = vadd.f32 %v862_v63, %v861_v55 }
  0x71   : > { %v850_v17 = vrot.slane %v849_v0, 1  ;;  %v869_v18 = vrot.slane %v868_v10, 2  ;;  %v876_v19 = vrot.slane %v875_v11, 2  ;;  %v883_v20 = vrot.slane %v882_v12, 2 }
  0x72   : > { %v837_v21 = vadd.f32 %v836_v13, %v835_v60  ;;  %v844_v22 = vadd.f32 %v843_v14, %v842_v61  ;;  %v857_v23 = vrot.slane %v856_v15, 1  ;;  %v864_v24 = vrot.slane %v863_v16, 1 }
  0x73   : > { %v851_v25 = vadd.f32 %v850_v17, %v849_v0  ;;  %v870_v26 = vadd.f32 %v869_v18, %v868_v10  ;;  %v877_v27 = vadd.f32 %v876_v19, %v875_v11  ;;  %v884_v28 = vadd.f32 %v883_v20, %v882_v12 }
  0x74   : > { %v858_v29 = vadd.f32 %v857_v23, %v856_v15  ;;  %v865_v30 = vadd.f32 %v864_v24, %v863_v16  ;;  %vm2674_vm10 = vcmask 1041409   ;;  %vm2663_vm1 = vcmp.eq.s32.totalorder %v2012_v1, 2 }
  0x75   : > { %v1038_v31 = vsel %vm2674_vm10, %v844_v22, %v837_v21  ;;  %v871_v32 = vrot.slane %v870_v26, 1  ;;  %v878_v33 = vrot.slane %v877_v27, 1  ;;  %v885_v34 = vrot.slane %v884_v28, 1 }
  0x76   : > { %v1039_v35 = vsel %vm725_vm11, %v851_v25, %v1038_v31  ;;  %vm2662_vm2 = vcmp.eq.s32.totalorder %v2014_v2, 2  ;;  %vm2661_vm3 = vcmp.eq.s32.totalorder %v2016_v3, 2  ;;  %vm2660_vm4 = vcmp.eq.s32.totalorder %v2018_v4, 2 }
  0x77   : > { %v1040_v36 = vsel %vm727_vm12, %v858_v29, %v1039_v35  ;;  %v872_v37 = vadd.f32 %v871_v32, %v870_v26  ;;  %v879_v38 = vadd.f32 %v878_v33, %v877_v27  ;;  %v886_v39 = vadd.f32 %v885_v34, %v884_v28 }
  0x78   : > { %v1041_v40 = vsel %vm729_vm13, %v865_v30, %v1040_v36  ;;  %vm2659_vm10 = vcmp.eq.s32.totalorder %v2020_v5, 2  ;;  %vm2658_vm5 = vcmp.eq.s32.totalorder %v2022_v6, 2  ;;  %vm2657_vm6 = vcmp.eq.s32.totalorder %v2024_v7, 2 }
  0x79   : > { %vm2656_vm7 = vcmp.eq.s32.totalorder %v2026_v8, 2  ;;  %v1042_v42 = vsel %vm731_vm14, %v872_v37, %v1041_v40  ;;  %v1559_v43 = vsel %vm2663_vm1, 1.0, %v1869_v9  ;;  %v1560_v44 = vsel %vm2662_vm2, 1.0, %v1869_v9 }
  0x7a   : > { %v1561_v45 = vsel %vm2661_vm3, 1.0, %v1869_v9  ;;  %v1043_v46 = vsel %vm733_vm15, %v879_v38, %v1042_v42  ;;  %v1562_v47 = vsel %vm2660_vm4, 1.0, %v1869_v9  ;;  %v1563_v48 = vsel %vm2659_vm10, 1.0, %v1869_v9 }
  0x7b   : > { %v1564_v49 = vsel %vm2658_vm5, 1.0, %v1869_v9  ;;  %v1044_v50 = vsel %vm735_vm0, %v886_v39, %v1043_v46  ;;  %v1565_v51 = vsel %vm2657_vm6, 1.0, %v1869_v9  ;;  %v1566_v52 = vsel %vm2656_vm7, 1.0, %v1869_v9 }
  0x7c   : > { %v887_v53 = vsel %vm466_vm9, %v1559_v43, 0.0  ;;  %v1064_v54 = vadd.f32 %v1044_v50, %v772_v41  ;;  %v894_v56 = vsel %vm466_vm9, %v1560_v44, 0.0  ;;  %v901_v57 = vsel %vm466_vm9, %v1561_v45, 0.0 }
  0x7d   : > { %v888_v55 = vrot.slane %v887_v53, 4  ;;  %v895_v58 = vrot.slane %v894_v56, 4  ;;  %v902_v59 = vrot.slane %v901_v57, 4  ;;  %v908_v60 = vsel %vm466_vm9, %v1562_v47, 0.0 }
  0x7e   : > { %v915_v61 = vsel %vm466_vm9, %v1563_v48, 0.0  ;;  %1068 = vst.msk [vmem:[#allocation8 + $0x8] sm:$0xff] %vm766_vm8, %v1064_v54  ;;  %v909_v63 = vrot.slane %v908_v60, 4  ;;  %v922_v10 = vsel %vm466_vm9, %v1564_v49, 0.0  ;;  %v929_v14 = vsel %vm466_vm9, %v1565_v51, 0.0 }
  0x7f   : > { %v889_v62 = vadd.f32 %v888_v55, %v887_v53  ;;  %v916_v0 = vrot.slane %v915_v61, 4  ;;  %v896_v11 = vadd.f32 %v895_v58, %v894_v56  ;;  %v903_v12 = vadd.f32 %v902_v59, %v901_v57  ;;  %v773_v59 = vld [vmem:[#allocation8 + $0x10] sm:$0xff] }
  0x80   : > { %v923_v13 = vrot.slane %v922_v10, 4  ;;  %v910_v16 = vadd.f32 %v909_v63, %v908_v60  ;;  %v930_v18 = vrot.slane %v929_v14, 4  ;;  %v936_v22 = vsel %vm466_vm9, %v1566_v52, 0.0 }
  0x81   : > { %v890_v15 = vrot.slane %v889_v62, 2  ;;  %v917_v17 = vadd.f32 %v916_v0, %v915_v61  ;;  %v897_v19 = vrot.slane %v896_v11, 2  ;;  %v904_v20 = vrot.slane %v903_v12, 2 }
  0x82   : > { %v924_v21 = vadd.f32 %v923_v13, %v922_v10  ;;  %v911_v24 = vrot.slane %v910_v16, 2  ;;  %v931_v26 = vadd.f32 %v930_v18, %v929_v14  ;;  %v937_v30 = vrot.slane %v936_v22, 4 }
  0x83   : > { %v891_v23 = vadd.f32 %v890_v15, %v889_v62  ;;  %v918_v25 = vrot.slane %v917_v17, 2  ;;  %v898_v27 = vadd.f32 %v897_v19, %v896_v11  ;;  %v905_v28 = vadd.f32 %v904_v20, %v903_v12 }
  0x84   : > { %v925_v29 = vrot.slane %v924_v21, 2  ;;  %v912_v32 = vadd.f32 %v911_v24, %v910_v16  ;;  %v932_v34 = vrot.slane %v931_v26, 2  ;;  %v938_v38 = vadd.f32 %v937_v30, %v936_v22 }
  0x85   : > { %v892_v31 = vrot.slane %v891_v23, 1  ;;  %v919_v33 = vadd.f32 %v918_v25, %v917_v17  ;;  %v899_v35 = vrot.slane %v898_v27, 1  ;;  %v906_v36 = vrot.slane %v905_v28, 1 }
  0x86   : > { %v926_v37 = vadd.f32 %v925_v29, %v924_v21  ;;  %v913_v40 = vrot.slane %v912_v32, 1  ;;  %v933_v42 = vadd.f32 %v932_v34, %v931_v26  ;;  %v939_v46 = vrot.slane %v938_v38, 2 }
  0x87   : > { %v893_v39 = vadd.f32 %v892_v31, %v891_v23  ;;  %v920_v41 = vrot.slane %v919_v33, 1  ;;  %v900_v43 = vadd.f32 %v899_v35, %v898_v27  ;;  %v907_v44 = vadd.f32 %v906_v36, %v905_v28 }
  0x88   : > { %v927_v45 = vrot.slane %v926_v37, 1  ;;  %v914_v47 = vadd.f32 %v913_v40, %v912_v32  ;;  %v934_v49 = vrot.slane %v933_v42, 1  ;;  %vm358_vm7 = vcmp.eq.s32.totalorder %v2012_v1, 3 }
  0x89   : > { %v921_v48 = vadd.f32 %v920_v41, %v919_v33  ;;  %v940_v51 = vadd.f32 %v939_v46, %v938_v38  ;;  %vm2675_vm6 = vcmask 1041409   ;;  %vm359_vm5 = vcmp.eq.s32.totalorder %v2014_v2, 3 }
  0x8a   : > { %v928_v50 = vadd.f32 %v927_v45, %v926_v37  ;;  %v1045_v52 = vsel %vm2675_vm6, %v900_v43, %v893_v39  ;;  %v935_v53 = vadd.f32 %v934_v49, %v933_v42  ;;  %vm360_vm10 = vcmp.eq.s32.totalorder %v2016_v3, 3 }
  0x8b   : > { %v1046_v54 = vsel %vm725_vm11, %v907_v44, %v1045_v52  ;;  %vm361_vm4 = vcmp.eq.s32.totalorder %v2018_v4, 3  ;;  %v941_v55 = vrot.slane %v940_v51, 1  ;;  %vm2669_vm3 = vcmp.eq.s32.totalorder %v2020_v5, 3 }
  0x8c   : > { %v1047_v56 = vsel %vm727_vm12, %v914_v47, %v1046_v54  ;;  %vm2668_vm2 = vcmp.eq.s32.totalorder %v2022_v6, 3  ;;  %vm2666_vm6 = vcmp.eq.s32.totalorder %v2024_v7, 3  ;;  %vm2664_vm1 = vcmp.eq.s32.totalorder %v2026_v8, 3 }
  0x8d   : > { %v1048_v57 = vsel %vm729_vm13, %v921_v48, %v1047_v56  ;;  %v1567_v58 = vsel %vm358_vm7, 1.0, %v1869_v9  ;;  %v942_v60 = vadd.f32 %v941_v55, %v940_v51  ;;  %v1568_v62 = vsel %vm359_vm5, 1.0, %v1869_v9  ;;  %v2213_v56 = vld [vmem:[%s2001_s5] sm:$0xf] }
  0x8e   : > { %v1049_v61 = vsel %vm731_vm14, %v928_v50, %v1048_v57  ;;  %v1569_v63 = vsel %vm360_vm10, 1.0, %v1869_v9  ;;  %v1570_v10 = vsel %vm361_vm4, 1.0, %v1869_v9  ;;  %v1571_v11 = vsel %vm2669_vm3, 1.0, %v1869_v9 }
  0x8f   : > { %v1050_v0 = vsel %vm733_vm15, %v935_v53, %v1049_v61  ;;  %v1572_v12 = vsel %vm2668_vm2, 1.0, %v1869_v9  ;;  %v1573_v14 = vsel %vm2666_vm6, 1.0, %v1869_v9  ;;  %v1574_v15 = vsel %vm2664_vm1, 1.0, %v1869_v9 }
  0x90   : > { %v1051_v13 = vsel %vm735_vm0, %v942_v60, %v1050_v0  ;;  %v943_v16 = vsel %vm466_vm9, %v1567_v58, 0.0  ;;  %v950_v19 = vsel %vm466_vm9, %v1568_v62, 0.0  ;;  %v957_v20 = vsel %vm466_vm9, %v1569_v63, 0.0 }
  0x91   : > { %v1065_v17 = vadd.f32 %v1051_v13, %v773_v59  ;;  %v944_v18 = vrot.slane %v943_v16, 4  ;;  %v951_v21 = vrot.slane %v950_v19, 4  ;;  %v958_v22 = vrot.slane %v957_v20, 4 }
  0x92   : > { %v964_v23 = vsel %vm466_vm9, %v1570_v10, 0.0  ;;  %v971_v24 = vsel %vm466_vm9, %v1571_v11, 0.0  ;;  %v978_v9 = vsel %vm466_vm9, %v1572_v12, 0.0  ;;  %v985_v31 = vsel %vm466_vm9, %v1573_v14, 0.0  ;;  %v2216_v10 = vld [vmem:[%s2001_s5 + $0x4] sm:$0xf] }
  0x93   : > { %1069 = vst.msk [vmem:[#allocation8 + $0x10] sm:$0xff] %vm766_vm8, %v1065_v17  ;;  %v945_v25 = vadd.f32 %v944_v18, %v943_v16  ;;  %v965_v26 = vrot.slane %v964_v23, 4  ;;  %v972_v27 = vrot.slane %v971_v24, 4  ;;  %v952_v28 = vadd.f32 %v951_v21, %v950_v19  ;;  %v2219_v11 = vld [vmem:[%s2001_s5 + $0x8] sm:$0xf] }
  0x94   : > { %v959_v29 = vadd.f32 %v958_v22, %v957_v20  ;;  %v979_v30 = vrot.slane %v978_v9, 4  ;;  %v986_v35 = vrot.slane %v985_v31, 4  ;;  %v992_v39 = vsel %vm466_vm9, %v1574_v15, 0.0  ;;  %v2225_v19 = vld [vmem:[%s2001_s5 + $0xc] sm:$0xf] }
  0x95   : > { %v946_v32 = vrot.slane %v945_v25, 2  ;;  %v966_v33 = vadd.f32 %v965_v26, %v964_v23  ;;  %v973_v34 = vadd.f32 %v972_v27, %v971_v24  ;;  %v953_v36 = vrot.slane %v952_v28, 2  ;;  %v2228_v20 = vld [vmem:[%s2001_s5 + $0x10] sm:$0xf] }
  0x96   : > { %v960_v37 = vrot.slane %v959_v29, 2  ;;  %v980_v38 = vadd.f32 %v979_v30, %v978_v9  ;;  %v987_v43 = vadd.f32 %v986_v35, %v985_v31  ;;  %v993_v47 = vrot.slane %v992_v39, 4  ;;  %v2238_v30 = vld [vmem:[%s2001_s5 + $0x14] sm:$0xf] }
  0x97   : > { %v947_v40 = vadd.f32 %v946_v32, %v945_v25  ;;  %v967_v41 = vrot.slane %v966_v33, 2  ;;  %v974_v42 = vrot.slane %v973_v34, 2  ;;  %v954_v44 = vadd.f32 %v953_v36, %v952_v28 }
  0x98   : > { %v961_v45 = vadd.f32 %v960_v37, %v959_v29  ;;  %v981_v46 = vrot.slane %v980_v38, 2  ;;  %v988_v51 = vrot.slane %v987_v43, 2  ;;  %v994_v55 = vadd.f32 %v993_v47, %v992_v39 }
  0x99   : > { %v948_v48 = vrot.slane %v947_v40, 1  ;;  %v968_v49 = vadd.f32 %v967_v41, %v966_v33  ;;  %v975_v50 = vadd.f32 %v974_v42, %v973_v34  ;;  %v955_v52 = vrot.slane %v954_v44, 1  ;;  %v774_v34 = vld [vmem:[#allocation8 + $0x18] sm:$0xff] }
  0x9a   : > { %v962_v53 = vrot.slane %v961_v45, 1  ;;  %v982_v54 = vadd.f32 %v981_v46, %v980_v38  ;;  %v989_v60 = vadd.f32 %v988_v51, %v987_v43  ;;  %v995_v0 = vrot.slane %v994_v55, 2 }
  0x9b   : > { %v949_v57 = vadd.f32 %v948_v48, %v947_v40  ;;  %v969_v58 = vrot.slane %v968_v49, 1  ;;  %v976_v59 = vrot.slane %v975_v50, 1  ;;  %v956_v61 = vadd.f32 %v955_v52, %v954_v44  ;;  %v2247_v40 = vld [vmem:[%s2001_s5 + $0x18] sm:$0xf] }
  0x9c   : > { %v963_v62 = vadd.f32 %v962_v53, %v961_v45  ;;  %v983_v63 = vrot.slane %v982_v54, 1  ;;  %v990_v14 = vrot.slane %v989_v60, 1  ;;  %v467_v15 = vsel %vm466_vm9, %v2213_v56, 0.0 }
  0x9d   : > { %v970_v12 = vadd.f32 %v969_v58, %v968_v49  ;;  %v977_v13 = vadd.f32 %v976_v59, %v975_v50  ;;  %v996_v17 = vadd.f32 %v995_v0, %v994_v55  ;;  %vm2676_vm1 = vcmask 1041409   ;;  %v2253_v49 = vld [vmem:[%s2001_s5 + $0x1c] sm:$0xf] }
  0x9e   : > { %v984_v16 = vadd.f32 %v983_v63, %v982_v54  ;;  %v1052_v18 = vsel %vm2676_vm1, %v956_v61, %v949_v57  ;;  %v468_v21 = vrot.slane %v467_v15, 4  ;;  %v991_v22 = vadd.f32 %v990_v14, %v989_v60 }
  0x9f   : > { %v1053_v23 = vsel %vm725_vm11, %v963_v62, %v1052_v18  ;;  %v474_v24 = vsel %vm466_vm9, %v2216_v10, 0.0  ;;  %v481_v25 = vsel %vm466_vm9, %v2219_v11, 0.0  ;;  %v997_v26 = vrot.slane %v996_v17, 1  ;;  %v2259_v62 = vld [vmem:[%s2001_s5 + $0x20] sm:$0xf] }
  0xa0   : > { %v1054_v27 = vsel %vm727_vm12, %v970_v12, %v1053_v23  ;;  %v469_v9 = vadd.f32 %v468_v21, %v467_v15  ;;  %v475_v28 = vrot.slane %v474_v24, 4  ;;  %v482_v31 = vrot.slane %v481_v25, 4 }
  0xa1   : > { %v1055_v29 = vsel %vm729_vm13, %v977_v13, %v1054_v27  ;;  %v488_v32 = vsel %vm466_vm9, %v2225_v19, 0.0  ;;  %v495_v33 = vsel %vm466_vm9, %v2228_v20, 0.0  ;;  %v998_v35 = vadd.f32 %v997_v26, %v996_v17 }
  0xa2   : > { %v1056_v36 = vsel %vm731_vm14, %v984_v16, %v1055_v29  ;;  %v470_v37 = vrot.slane %v469_v9, 2  ;;  %v476_v38 = vadd.f32 %v475_v28, %v474_v24  ;;  %v483_v41 = vadd.f32 %v482_v31, %v481_v25 }
  0xa3   : > { %v1057_v39 = vsel %vm733_vm15, %v991_v22, %v1056_v36  ;;  %v489_v42 = vrot.slane %v488_v32, 4  ;;  %v496_v43 = vrot.slane %v495_v33, 4  ;;  %v502_v47 = vsel %vm466_vm9, %v2238_v30, 0.0 }
  0xa4   : > { %v1058_v44 = vsel %vm735_vm0, %v998_v35, %v1057_v39  ;;  %v471_v45 = vadd.f32 %v470_v37, %v469_v9  ;;  %v477_v46 = vrot.slane %v476_v38, 2  ;;  %v484_v50 = vrot.slane %v483_v41, 2  ;;  %v2266_v9 = vld [vmem:[%s2001_s5 + $0x24] sm:$0xf] }
  0xa5   : > { %v1066_v48 = vadd.f32 %v1058_v44, %v774_v34  ;;  %v490_v51 = vadd.f32 %v489_v42, %v488_v32  ;;  %v497_v52 = vadd.f32 %v496_v43, %v495_v33  ;;  %v503_v55 = vrot.slane %v502_v47, 4  ;;  %v2270_v32 = vld [vmem:[%s2001_s5 + $0x28] sm:$0xf] }
  0xa6   : > { %v472_v53 = vrot.slane %v471_v45, 1  ;;  %v478_v54 = vadd.f32 %v477_v46, %v476_v38  ;;  %v509_v57 = vsel %vm466_vm9, %v2247_v40, 0.0  ;;  %v485_v58 = vadd.f32 %v484_v50, %v483_v41  ;;  %v2274_v38 = vld [vmem:[%s2001_s5 + $0x2c] sm:$0xf]  ;;  %v2286_v46 = vld [vmem:[%s2001_s5 + $0x30] sm:$0xf] }
  0xa7   : > { %1070 = vst.msk [vmem:[#allocation8 + $0x18] sm:$0xff] %vm766_vm8, %v1066_v48  ;;  %v491_v59 = vrot.slane %v490_v51, 2  ;;  %v498_v60 = vrot.slane %v497_v52, 2  ;;  %v510_v61 = vrot.slane %v509_v57, 4  ;;  %v504_v12 = vadd.f32 %v503_v55, %v502_v47 }
  0xa8   : > { %v473_v63 = vadd.f32 %v472_v53, %v471_v45  ;;  %v479_v0 = vrot.slane %v478_v54, 1  ;;  %v516_v13 = vsel %vm466_vm9, %v2253_v49, 0.0  ;;  %v486_v14 = vrot.slane %v485_v58, 1 }
  0xa9   : > { %v492_v15 = vadd.f32 %v491_v59, %v490_v51  ;;  %v499_v16 = vadd.f32 %v498_v60, %v497_v52  ;;  %v511_v17 = vadd.f32 %v510_v61, %v509_v57  ;;  %v505_v21 = vrot.slane %v504_v12, 2 }
  0xaa   : > { %v480_v18 = vadd.f32 %v479_v0, %v478_v54  ;;  %v517_v22 = vrot.slane %v516_v13, 4  ;;  %v523_v23 = vsel %vm466_vm9, %v2259_v62, 0.0  ;;  %v487_v24 = vadd.f32 %v486_v14, %v485_v58 }
  0xab   : > { %v493_v25 = vrot.slane %v492_v15, 1  ;;  %v500_v26 = vrot.slane %v499_v16, 1  ;;  %v512_v27 = vrot.slane %v511_v17, 2  ;;  %v506_v28 = vadd.f32 %v505_v21, %v504_v12 }
  0xac   : > { %v518_v29 = vadd.f32 %v517_v22, %v516_v13  ;;  %v724_v31 = vsel %vm2676_vm1, %v480_v18, %v473_v63  ;;  %v524_v33 = vrot.slane %v523_v23, 4  ;;  %v530_v43 = vsel %vm466_vm9, %v2266_v9, 0.0 }
  0xad   : > { %v494_v34 = vadd.f32 %v493_v25, %v492_v15  ;;  %v501_v35 = vadd.f32 %v500_v26, %v499_v16  ;;  %v513_v36 = vadd.f32 %v512_v27, %v511_v17  ;;  %v726_v37 = vsel %vm725_vm11, %v487_v24, %v724_v31 }
  0xae   : > { %v507_v39 = vrot.slane %v506_v28, 1  ;;  %v519_v41 = vrot.slane %v518_v29, 2  ;;  %v525_v42 = vadd.f32 %v524_v33, %v523_v23  ;;  %v531_v47 = vrot.slane %v530_v43, 4 }
  0xaf   : > { %v514_v44 = vrot.slane %v513_v36, 1  ;;  %v728_v45 = vsel %vm727_vm12, %v494_v34, %v726_v37  ;;  %v537_v48 = vsel %vm466_vm9, %v2270_v32, 0.0 }
  0xb0   : > { %v508_v50 = vadd.f32 %v507_v39, %v506_v28  ;;  %v520_v51 = vadd.f32 %v519_v41, %v518_v29  ;;  %v730_v52 = vsel %vm729_vm13, %v501_v35, %v728_v45  ;;  %v526_v53 = vrot.slane %v525_v42, 2 }
  0xb1   : > { %1741 = shalt.err (!%p1738_p11)
}
  0xb2   : > { %s1871_s24 = smov 128   ;;  %s1872_s29 = smov 8   ;;  %v515_v54 = vadd.f32 %v514_v44, %v513_v36  ;;  %v532_v55 = vadd.f32 %v531_v47, %v530_v43  ;;  %v538_v57 = vrot.slane %v537_v48, 4  ;;  %v544_v58 = vsel %vm466_vm9, %v2274_v38, 0.0  ;;  %v2305_v61 = vld [vmem:[%s2001_s5 + $0x34] sm:$0xf] }
  0xb3   : > { %1592 = dma.vmem_to_hbm [thread:$0]  (%p2278_p7), %s1397_s23, 512, %s2637_s3, [#allocation9], %s1871_s24, %s1871_s24, %s1872_s29   ;;  %v521_v59 = vrot.slane %v520_v51, 1  ;;  %v732_v60 = vsel %vm731_vm14, %v508_v50, %v730_v52  ;;  %v527_v0 = vadd.f32 %v526_v53, %v525_v42  ;;  %v545_v12 = vrot.slane %v544_v58, 4  ;;  %v462_v17 = vld [vmem:[#allocation7] sm:$0xff] }
  0xb4   : > { %v2308_v63 = vld [vmem:[%s2001_s5 + $0x38] sm:$0xf]  ;;  %v734_v13 = vsel %vm733_vm15, %v515_v54, %v732_v60  ;;  %v533_v14 = vrot.slane %v532_v55, 2  ;;  %v539_v15 = vadd.f32 %v538_v57, %v537_v48  ;;  %v551_v16 = vsel %vm466_vm9, %v2286_v46, 0.0  ;;  %v2314_v24 = vld [vmem:[%s2001_s5 + $0x3c] sm:$0xf] }
  0xb5   : > { %v522_v18 = vadd.f32 %v521_v59, %v520_v51  ;;  %v528_v21 = vrot.slane %v527_v0, 1  ;;  %v546_v22 = vadd.f32 %v545_v12, %v544_v58  ;;  %v552_v23 = vrot.slane %v551_v16, 4  ;;  %v2322_v41 = vld [vmem:[%s2001_s5 + $0x40] sm:$0xf]  ;;  %s1873_s14 = smov [#allocation7]  }
  0xb6   : > { %v534_v25 = vadd.f32 %v533_v14, %v532_v55  ;;  %v540_v26 = vrot.slane %v539_v15, 2  ;;  %v558_v27 = vsel %vm466_vm9, %v2305_v61, 0.0  ;;  %v565_v28 = vsel %vm466_vm9, %v2308_v63, 0.0  ;;  %v2328_v55 = vld [vmem:[%s2001_s5 + $0x44] sm:$0xf]  ;;  %s1380_s15 = sshll.u32 %s1873_s14, 4  ;;  %s1381_s15 = int_to_ptr.vmem [resolvable:$true] %s1380_s15 }
  0xb7   : > { %v736_v29 = vsel %vm735_vm0, %v522_v18, %v734_v13  ;;  %v529_v31 = vadd.f32 %v528_v21, %v527_v0  ;;  %v547_v33 = vrot.slane %v546_v22, 2  ;;  %v553_v34 = vadd.f32 %v552_v23, %v551_v16  ;;  %s1752_s7 = scalar_lea.vmem %s1381_s15, 512  ;;  %p1759_p1 = scmp.lt.s32.totalorder %s1381_s15, %s1381_s15 }
  0xb8   : > { %v762_v35 = vadd.f32 %v736_v29, %v462_v17  ;;  %v535_v36 = vrot.slane %v534_v25, 1  ;;  %v541_v37 = vadd.f32 %v540_v26, %v539_v15  ;;  %v559_v39 = vrot.slane %v558_v27, 4  ;;  %v2334_v15 = vld [vmem:[%s2001_s5 + $0x48] sm:$0xf]  ;;  %p1753_p12 = scmp.ne.s32.totalorder %s1381_s15, %s1752_s7  ;;  %p1760_p2 = scmp.lt.s32.totalorder %s1752_s7, %s1752_s7 }
  0xb9   : > { %v548_v42 = vadd.f32 %v547_v33, %v546_v22  ;;  %v554_v43 = vrot.slane %v553_v34, 2  ;;  %v566_v44 = vrot.slane %v565_v28, 4  ;;  %v572_v45 = vsel %vm466_vm9, %v2314_v24, 0.0 }
  0xba   : > { %767 = vst.msk [vmem:[#allocation7] sm:$0xff] %vm766_vm8, %v762_v35  ;;  %v536_v47 = vadd.f32 %v535_v36, %v534_v25  ;;  %v542_v48 = vrot.slane %v541_v37, 1  ;;  %v560_v50 = vadd.f32 %v559_v39, %v558_v27  ;;  %v573_v51 = vrot.slane %v572_v45, 4  ;;  %v2341_v27 = vld [vmem:[%s2001_s5 + $0x4c] sm:$0xf]  ;;  %p1754_p13 = pnand %p1753_p12, %p2278_p7  ;;  %p1761_p9 = por %p1760_p2, %p1759_p1 }
  0xbb   : > { %v549_v52 = vrot.slane %v548_v42, 1  ;;  %v555_v53 = vadd.f32 %v554_v43, %v553_v34  ;;  %v567_v54 = vadd.f32 %v566_v44, %v565_v28  ;;  %v579_v57 = vsel %vm466_vm9, %v2322_v41, 0.0 }
  0xbc   : > { %v543_v58 = vadd.f32 %v542_v48, %v541_v37  ;;  %v561_v59 = vrot.slane %v560_v50, 2  ;;  %v574_v60 = vadd.f32 %v573_v51, %v572_v45  ;;  %v737_v0 = vsel %vm2676_vm1, %v536_v47, %v529_v31  ;;  %v2347_v37 = vld [vmem:[%s2001_s5 + $0x50] sm:$0xf]  ;;  %p1755_p0 = pneg %p1754_p13 }
  0xbd   : > { %v550_v12 = vadd.f32 %v549_v52, %v548_v42  ;;  %v556_v13 = vrot.slane %v555_v53, 1  ;;  %v568_v14 = vrot.slane %v567_v54, 2  ;;  %v580_v16 = vrot.slane %v579_v57, 4 }
  0xbe   : > { %v562_v17 = vadd.f32 %v561_v59, %v560_v50  ;;  %v575_v18 = vrot.slane %v574_v60, 2  ;;  %v738_v21 = vsel %vm725_vm11, %v543_v58, %v737_v0  ;;  %v586_v22 = vsel %vm466_vm9, %v2328_v55, 0.0  ;;  %v2352_v50 = vld [vmem:[%s2001_s5 + $0x54] sm:$0xf]  ;;  %p1762_p10 = pnand %p1761_p9, %p1755_p0 }
  0xbf   : > { %v557_v23 = vadd.f32 %v556_v13, %v555_v53  ;;  %v569_v25 = vadd.f32 %v568_v14, %v567_v54  ;;  %v739_v26 = vsel %vm727_vm12, %v550_v12, %v738_v21  ;;  %v581_v28 = vadd.f32 %v580_v16, %v579_v57  ;;  %v463_v54 = vld [vmem:[#allocation7 + $0x8] sm:$0xff]  ;;  %v2359_v12 = vld [vmem:[%s2001_s5 + $0x58] sm:$0xf] }
  0xc0   : > { %v563_v29 = vrot.slane %v562_v17, 1  ;;  %v576_v31 = vadd.f32 %v575_v18, %v574_v60  ;;  %v587_v33 = vrot.slane %v586_v22, 4  ;;  %v593_v34 = vsel %vm466_vm9, %v2334_v15, 0.0  ;;  %v2363_v18 = vld [vmem:[%s2001_s5 + $0x5c] sm:$0xf] }
  0xc1   : > { %v570_v35 = vrot.slane %v569_v25, 1  ;;  %v740_v36 = vsel %vm729_vm13, %v557_v23, %v739_v26  ;;  %v582_v39 = vrot.slane %v581_v28, 2  ;;  %v594_v42 = vrot.slane %v593_v34, 4 }
  0xc2   : > { %v564_v43 = vadd.f32 %v563_v29, %v562_v17  ;;  %v577_v44 = vrot.slane %v576_v31, 1  ;;  %v588_v45 = vadd.f32 %v587_v33, %v586_v22  ;;  %v600_v47 = vsel %vm466_vm9, %v2341_v27, 0.0 }
  0xc3   : > { %v571_v48 = vadd.f32 %v570_v35, %v569_v25  ;;  %v583_v51 = vadd.f32 %v582_v39, %v581_v28  ;;  %v595_v52 = vadd.f32 %v594_v42, %v593_v34  ;;  %v601_v53 = vrot.slane %v600_v47, 4 }
  0xc4   : > { %v578_v57 = vadd.f32 %v577_v44, %v576_v31  ;;  %v741_v58 = vsel %vm731_vm14, %v564_v43, %v740_v36  ;;  %v589_v59 = vrot.slane %v588_v45, 2  ;;  %v607_v60 = vsel %vm466_vm9, %v2347_v37, 0.0  ;;  %v2370_v36 = vld [vmem:[%s2001_s5 + $0x60] sm:$0xf] }
  0xc5   : > { %v742_v0 = vsel %vm733_vm15, %v571_v48, %v741_v58  ;;  %v584_v13 = vrot.slane %v583_v51, 1  ;;  %v596_v14 = vrot.slane %v595_v52, 2  ;;  %v602_v16 = vadd.f32 %v601_v53, %v600_v47 }
  0xc6   : > { %v743_v17 = vsel %vm735_vm0, %v578_v57, %v742_v0  ;;  %v590_v21 = vadd.f32 %v589_v59, %v588_v45  ;;  %v608_v22 = vrot.slane %v607_v60, 4  ;;  %v614_v23 = vsel %vm466_vm9, %v2352_v50, 0.0  ;;  %v2376_v57 = vld [vmem:[%s2001_s5 + $0x64] sm:$0xf] }
  0xc7   : > { %v763_v25 = vadd.f32 %v743_v17, %v463_v54  ;;  %v585_v26 = vadd.f32 %v584_v13, %v583_v51  ;;  %v597_v28 = vadd.f32 %v596_v14, %v595_v52  ;;  %v603_v29 = vrot.slane %v602_v16, 2 }
  0xc8   : > { %v591_v31 = vrot.slane %v590_v21, 1  ;;  %v609_v33 = vadd.f32 %v608_v22, %v607_v60  ;;  %v615_v34 = vrot.slane %v614_v23, 4  ;;  %v621_v35 = vsel %vm466_vm9, %v2359_v12, 0.0 }
  0xc9   : > { %768 = vst.msk [vmem:[#allocation7 + $0x8] sm:$0xff] %vm766_vm8, %v763_v25  ;;  %v598_v39 = vrot.slane %v597_v28, 1  ;;  %v604_v42 = vadd.f32 %v603_v29, %v602_v16  ;;  %v622_v43 = vrot.slane %v621_v35, 4  ;;  %v628_v44 = vsel %vm466_vm9, %v2363_v18, 0.0 }
  0xca   : > { %v592_v45 = vadd.f32 %v591_v31, %v590_v21  ;;  %v610_v47 = vrot.slane %v609_v33, 2  ;;  %v616_v48 = vadd.f32 %v615_v34, %v614_v23  ;;  %v629_v51 = vrot.slane %v628_v44, 4  ;;  %v2383_v21 = vld [vmem:[%s2001_s5 + $0x68] sm:$0xf]  ;;  %v2389_v34 = vld [vmem:[%s2001_s5 + $0x6c] sm:$0xf] }
  0xcb   : > { %v599_v52 = vadd.f32 %v598_v39, %v597_v28  ;;  %v605_v53 = vrot.slane %v604_v42, 1  ;;  %v623_v54 = vadd.f32 %v622_v43, %v621_v35  ;;  %v635_v58 = vsel %vm466_vm9, %v2370_v36, 0.0 }
  0xcc   : > { %v611_v59 = vadd.f32 %v610_v47, %v609_v33  ;;  %v617_v60 = vrot.slane %v616_v48, 2  ;;  %v630_v0 = vadd.f32 %v629_v51, %v628_v44  ;;  %v744_v13 = vsel %vm2676_vm1, %v592_v45, %v585_v26  ;;  %v2394_v47 = vld [vmem:[%s2001_s5 + $0x70] sm:$0xf] }
  0xcd   : > { %v606_v14 = vadd.f32 %v605_v53, %v604_v42  ;;  %v624_v16 = vrot.slane %v623_v54, 2  ;;  %v745_v17 = vsel %vm725_vm11, %v599_v52, %v744_v13  ;;  %v636_v22 = vrot.slane %v635_v58, 4 }
  0xce   : > { %v612_v23 = vrot.slane %v611_v59, 1  ;;  %v618_v25 = vadd.f32 %v617_v60, %v616_v48  ;;  %v631_v28 = vrot.slane %v630_v0, 2  ;;  %v642_v29 = vsel %vm466_vm9, %v2376_v57, 0.0 }
  0xcf   : > { %v625_v31 = vadd.f32 %v624_v16, %v623_v54  ;;  %v746_v33 = vsel %vm727_vm12, %v606_v14, %v745_v17  ;;  %v637_v26 = vadd.f32 %v636_v22, %v635_v58  ;;  %v643_v35 = vrot.slane %v642_v29, 4  ;;  %v464_v17 = vld [vmem:[#allocation7 + $0x10] sm:$0xff] }
  0xd0   : > { %v613_v39 = vadd.f32 %v612_v23, %v611_v59  ;;  %v619_v42 = vrot.slane %v618_v25, 1  ;;  %v632_v43 = vadd.f32 %v631_v28, %v630_v0  ;;  %v649_v44 = vsel %vm466_vm9, %v2383_v21, 0.0  ;;  %v2400_v0 = vld [vmem:[%s2001_s5 + $0x74] sm:$0xf] }
  0xd1   : > { %v626_v45 = vrot.slane %v625_v31, 1  ;;  %v638_v48 = vrot.slane %v637_v26, 2  ;;  %v644_v51 = vadd.f32 %v643_v35, %v642_v29  ;;  %v650_v52 = vrot.slane %v649_v44, 4  ;;  %2678 = vst [vmem:[#allocation15_spill] sm:$0xff] %v2400_v0 }
  0xd2   : > { %v620_v53 = vadd.f32 %v619_v42, %v618_v25  ;;  %v633_v54 = vrot.slane %v632_v43, 1  ;;  %v747_v60 = vsel %vm729_vm13, %v613_v39, %v746_v33  ;;  %v656_v58 = vsel %vm466_vm9, %v2389_v34, 0.0  ;;  %v2407_v33 = vld [vmem:[%s2001_s5 + $0x78] sm:$0xf] }
  0xd3   : > { %v627_v59 = vadd.f32 %v626_v45, %v625_v31  ;;  %v639_v13 = vadd.f32 %v638_v48, %v637_v26  ;;  %v645_v14 = vrot.slane %v644_v51, 2  ;;  %v651_v16 = vadd.f32 %v650_v52, %v649_v44  ;;  %2679 = vst [vmem:[#allocation16_spill] sm:$0xff] %v2407_v33  ;;  %v2411_v26 = vld [vmem:[%s2001_s5 + $0x7c] sm:$0xf] }
  0xd4   : > { %v634_v22 = vadd.f32 %v633_v54, %v632_v43  ;;  %v748_v23 = vsel %vm731_vm14, %v620_v53, %v747_v60  ;;  %v657_v28 = vrot.slane %v656_v58, 4  ;;  %v663_v25 = vsel %vm466_vm9, %v2394_v47, 0.0 }
  0xd5   : > { %v749_v29 = vsel %vm733_vm15, %v627_v59, %v748_v23  ;;  %v640_v35 = vrot.slane %v639_v13, 1  ;;  %v646_v31 = vadd.f32 %v645_v14, %v644_v51  ;;  %v652_v39 = vrot.slane %v651_v16, 2 }
  0xd6   : > { %v750_v42 = vsel %vm735_vm0, %v634_v22, %v749_v29  ;;  %v658_v44 = vadd.f32 %v657_v28, %v656_v58  ;;  %v664_v45 = vrot.slane %v663_v25, 4  ;;  %v670_v43 = vsel %vm466_vm9, %v2400_v0, 0.0 }
  0xd7   : > { %v764_v48 = vadd.f32 %v750_v42, %v464_v17  ;;  %v641_v52 = vadd.f32 %v640_v35, %v639_v13  ;;  %v647_v53 = vrot.slane %v646_v31, 1  ;;  %v653_v54 = vadd.f32 %v652_v39, %v651_v16 }
  0xd8   : > { %v659_v60 = vrot.slane %v658_v44, 2  ;;  %v665_v59 = vadd.f32 %v664_v45, %v663_v25  ;;  %v671_v23 = vrot.slane %v670_v43, 4  ;;  %v677_v51 = vsel %vm466_vm9, %v2407_v33, 0.0 }
  0xd9   : > { %769 = vst.msk [vmem:[#allocation7 + $0x10] sm:$0xff] %vm766_vm8, %v764_v48  ;;  %v648_v14 = vadd.f32 %v647_v53, %v646_v31  ;;  %v654_v22 = vrot.slane %v653_v54, 1  ;;  %v678_v29 = vrot.slane %v677_v51, 4  ;;  %v684_v58 = vsel %vm466_vm9, %v2411_v26, 0.0 }
  0xda   : > { %v660_v28 = vadd.f32 %v659_v60, %v658_v44  ;;  %v666_v0 = vrot.slane %v665_v59, 2  ;;  %v672_v17 = vadd.f32 %v671_v23, %v670_v43  ;;  %v685_v13 = vrot.slane %v684_v58, 4 }
  0xdb   : > { %v655_v35 = vadd.f32 %v654_v22, %v653_v54  ;;  %v679_v16 = vadd.f32 %v678_v29, %v677_v51  ;;  %v751_v25 = vsel %vm2676_vm1, %v648_v14, %v641_v52  ;;  %vm2680_vm6 = vcmp.eq.s32.totalorder %v2012_v1, 0 }
  0xdc   : > { %v430_v39 = vsel %vm2680_vm6, %v2213_v56, 0.0  ;;  %v661_v42 = vrot.slane %v660_v28, 1  ;;  %v667_v45 = vadd.f32 %v666_v0, %v665_v59  ;;  %v673_v31 = vrot.slane %v672_v17, 2 }
  0xdd   : > { %v686_v48 = vadd.f32 %v685_v13, %v684_v58  ;;  %v680_v53 = vrot.slane %v679_v16, 2  ;;  %v752_v33 = vsel %vm725_vm11, %v655_v35, %v751_v25  ;;  %vm2681_vm2 = vcmp.eq.s32.totalorder %v2014_v2, 0 }
  0xde   : > { %v431_v44 = vsel %vm2681_vm2, %v2216_v10, 0.0  ;;  %vm2682_vm3 = vcmp.eq.s32.totalorder %v2016_v3, 0  ;;  %v662_v52 = vadd.f32 %v661_v42, %v660_v28  ;;  %v668_v54 = vrot.slane %v667_v45, 1  ;;  %v465_v42 = vld [vmem:[#allocation7 + $0x18] sm:$0xff] }
  0xdf   : > { %v432_v43 = vsel %vm2682_vm3, %v2219_v11, 0.0  ;;  %v674_v60 = vadd.f32 %v673_v31, %v672_v17  ;;  %v687_v23 = vrot.slane %v686_v48, 2  ;;  %v681_v56 = vadd.f32 %v680_v53, %v679_v16 }
  0xe0   : > { %vm2683_vm6 = vcmp.eq.s32.totalorder %v2018_v4, 0  ;;  %vm2684_vm1 = vcmp.eq.s32.totalorder %v2020_v5, 0  ;;  %vm2685_vm2 = vcmp.eq.s32.totalorder %v2022_v6, 0  ;;  %v669_v51 = vadd.f32 %v668_v54, %v667_v45 }
  0xe1   : > { %v433_v0 = vsel %vm2683_vm6, %v2225_v19, 0.0  ;;  %v434_v59 = vsel %vm2684_vm1, %v2228_v20, 0.0  ;;  %v435_v10 = vsel %vm2685_vm2, %v2238_v30, 0.0  ;;  %v675_v14 = vrot.slane %v674_v60, 1 }
  0xe2   : > { %v688_v11 = vadd.f32 %v687_v23, %v686_v48  ;;  %v753_v22 = vsel %vm727_vm12, %v662_v52, %v752_v33  ;;  %v682_v29 = vrot.slane %v681_v56, 1  ;;  %vm2686_vm3 = vcmp.eq.s32.totalorder %v2024_v7, 0 }
  0xe3   : > { %v436_v58 = vsel %vm2686_vm3, %v2247_v40, 0.0  ;;  %vm2687_vm6 = vcmp.eq.s32.totalorder %v2026_v8, 0  ;;  %v1075_v20 = vsel %vm466_vm9, %v430_v39, 0.0  ;;  %v676_v28 = vadd.f32 %v675_v14, %v674_v60 }
  0xe4   : > { %v437_v19 = vsel %vm2687_vm6, %v2253_v49, 0.0  ;;  %v689_v17 = vrot.slane %v688_v11, 1  ;;  %v754_v30 = vsel %vm729_vm13, %v669_v51, %v753_v22  ;;  %v1076_v13 = vrot.slane %v1075_v20, 4 }
  0xe5   : > { %v683_v35 = vadd.f32 %v682_v29, %v681_v56  ;;  %v1082_v16 = vsel %vm466_vm9, %v431_v44, 0.0  ;;  %v1089_v33 = vsel %vm466_vm9, %v432_v43, 0.0  ;;  %v1096_v25 = vsel %vm466_vm9, %v433_v0, 0.0 }
  0xe6   : > { %v690_v40 = vadd.f32 %v689_v17, %v688_v11  ;;  %v755_v45 = vsel %vm731_vm14, %v676_v28, %v754_v30  ;;  %v1077_v31 = vadd.f32 %v1076_v13, %v1075_v20  ;;  %v1083_v49 = vrot.slane %v1082_v16, 4 }
  0xe7   : > { %v756_v39 = vsel %vm733_vm15, %v683_v35, %v755_v45  ;;  %v1090_v48 = vrot.slane %v1089_v33, 4  ;;  %v1097_v53 = vrot.slane %v1096_v25, 4  ;;  %v1103_v52 = vsel %vm466_vm9, %v434_v59, 0.0 }
  0xe8   : > { %v757_v44 = vsel %vm735_vm0, %v690_v40, %v756_v39  ;;  %v1078_v54 = vrot.slane %v1077_v31, 2  ;;  %v1084_v43 = vadd.f32 %v1083_v49, %v1082_v16  ;;  %v1104_v60 = vrot.slane %v1103_v52, 4 }
  0xe9   : > { %v765_v23 = vadd.f32 %v757_v44, %v465_v42  ;;  %v1091_v56 = vadd.f32 %v1090_v48, %v1089_v33  ;;  %v1098_v0 = vadd.f32 %v1097_v53, %v1096_v25  ;;  %v1110_v51 = vsel %vm466_vm9, %v435_v10, 0.0 }
  0xea   : > { %v1079_v14 = vadd.f32 %v1078_v54, %v1077_v31  ;;  %v1085_v11 = vrot.slane %v1084_v43, 2  ;;  %v1105_v22 = vadd.f32 %v1104_v60, %v1103_v52  ;;  %v1111_v29 = vrot.slane %v1110_v51, 4 }
  0xeb   : > { %770 = vst.msk [vmem:[#allocation7 + $0x18] sm:$0xff] %vm766_vm8, %v765_v23  ;;  %v1092_v20 = vrot.slane %v1091_v56, 2  ;;  %v1099_v59 = vrot.slane %v1098_v0, 2  ;;  %v1117_v28 = vsel %vm466_vm9, %v436_v58, 0.0  ;;  %v1124_v17 = vsel %vm466_vm9, %v437_v19, 0.0 }
  0xec   : > { %v1080_v30 = vrot.slane %v1079_v14, 1  ;;  %v1086_v13 = vadd.f32 %v1085_v11, %v1084_v43  ;;  %v1106_v35 = vrot.slane %v1105_v22, 2  ;;  %v1112_v16 = vadd.f32 %v1111_v29, %v1110_v51 }
  0xed   : > { %1765 = shalt.err (!%p1762_p10)
}
  0xee   : > { %1590 = dma.vmem_to_hbm [thread:$0]  (%p2278_p7), %s1381_s15, 512, %s2636_s2, [#allocation4], %s1871_s24, %s1871_s24, %s1872_s29   ;;  %v1093_v10 = vadd.f32 %v1092_v20, %v1091_v56  ;;  %v1100_v58 = vadd.f32 %v1099_v59, %v1098_v0  ;;  %v1118_v19 = vrot.slane %v1117_v28, 4  ;;  %v1125_v33 = vrot.slane %v1124_v17, 4 }
  0xef   : > { %v1081_v25 = vadd.f32 %v1080_v30, %v1079_v14  ;;  %v1087_v42 = vrot.slane %v1086_v13, 1  ;;  %v1107_v40 = vadd.f32 %v1106_v35, %v1105_v22  ;;  %v1113_v45 = vrot.slane %v1112_v16, 2  ;;  %s1874_s28 = smov [#allocation10]  }
  0xf0   : > { %v1094_v31 = vrot.slane %v1093_v10, 1  ;;  %v1101_v49 = vrot.slane %v1100_v58, 1  ;;  %v1119_v39 = vadd.f32 %v1118_v19, %v1117_v28  ;;  %v1126_v48 = vadd.f32 %v1125_v33, %v1124_v17  ;;  %s1412_s25 = sshll.u32 %s1874_s28, 4  ;;  %s1413_s25 = int_to_ptr.vmem [resolvable:$true] %s1412_s25 }
  0xf1   : > { %v1088_v53 = vadd.f32 %v1087_v42, %v1086_v13  ;;  %v1108_v52 = vrot.slane %v1107_v40, 1  ;;  %v1114_v44 = vadd.f32 %v1113_v45, %v1112_v16  ;;  %vm2688_vm1 = vcmp.eq.s32.totalorder %v2012_v1, 1  ;;  %v1071_v42 = vld [vmem:[#allocation10] sm:$0xff]  ;;  %s1776_s30 = scalar_lea.vmem %s1413_s25, 512  ;;  %p1783_p6 = scmp.lt.s32.totalorder %s1413_s25, %s1413_s25 }
  0xf2   : > { %v438_v54 = vsel %vm2688_vm1, %v2259_v62, 0.0  ;;  %v1095_v43 = vadd.f32 %v1094_v31, %v1093_v10  ;;  %v1102_v60 = vadd.f32 %v1101_v49, %v1100_v58  ;;  %v1120_v23 = vrot.slane %v1119_v39, 2  ;;  %p1777_p3 = scmp.ne.s32.totalorder %s1413_s25, %s1776_s30  ;;  %p1784_p8 = scmp.lt.s32.totalorder %s1776_s30, %s1776_s30 }
  0xf3   : > { %v1127_v56 = vrot.slane %v1126_v48, 2  ;;  %v1109_v0 = vadd.f32 %v1108_v52, %v1107_v40  ;;  %v1115_v51 = vrot.slane %v1114_v44, 1  ;;  %vm2689_vm2 = vcmask 1041409  }
  0xf4   : > { %v1331_v14 = vsel %vm2689_vm2, %v1088_v53, %v1081_v25  ;;  %vm2690_vm3 = vcmp.eq.s32.totalorder %v2014_v2, 1  ;;  %v1121_v22 = vadd.f32 %v1120_v23, %v1119_v39  ;;  %vm2691_vm6 = vcmp.eq.s32.totalorder %v2016_v3, 1  ;;  %p1778_p4 = pnand %p1777_p3, %p2278_p7  ;;  %p1785_p11 = por %p1784_p8, %p1783_p6 }
  0xf5   : > { %v439_v11 = vsel %vm2690_vm3, %v2266_v9, 0.0  ;;  %v1128_v29 = vadd.f32 %v1127_v56, %v1126_v48  ;;  %v1332_v20 = vsel %vm725_vm11, %v1095_v43, %v1331_v14  ;;  %v440_v62 = vsel %vm2691_vm6, %v2270_v32, 0.0 }
  0xf6   : > { %v1116_v59 = vadd.f32 %v1115_v51, %v1114_v44  ;;  %v1333_v28 = vsel %vm727_vm12, %v1102_v60, %v1332_v20  ;;  %vm2692_vm1 = vcmp.eq.s32.totalorder %v2018_v4, 1  ;;  %vm2693_vm2 = vcmp.eq.s32.totalorder %v2020_v5, 1  ;;  %p1779_p5 = pneg %p1778_p4 }
  0xf7   : > { %v441_v17 = vsel %vm2692_vm1, %v2274_v38, 0.0  ;;  %v442_v30 = vsel %vm2693_vm2, %v2286_v46, 0.0  ;;  %v1122_v9 = vrot.slane %v1121_v22, 1  ;;  %v1129_v13 = vrot.slane %v1128_v29, 1 }
  0xf8   : > { %v1334_v35 = vsel %vm729_vm13, %v1109_v0, %v1333_v28  ;;  %vm2694_vm3 = vcmp.eq.s32.totalorder %v2022_v6, 1  ;;  %vm2695_vm6 = vcmp.eq.s32.totalorder %v2024_v7, 1  ;;  %vm2696_vm1 = vcmp.eq.s32.totalorder %v2026_v8, 1  ;;  %p1786_p12 = pnand %p1785_p11, %p1779_p5 }
  0xf9   : > { %v443_v16 = vsel %vm2694_vm3, %v2305_v61, 0.0  ;;  %v1335_v32 = vsel %vm731_vm14, %v1116_v59, %v1334_v35  ;;  %v444_v10 = vsel %vm2695_vm6, %v2308_v63, 0.0  ;;  %v445_v38 = vsel %vm2696_vm1, %v2314_v24, 0.0 }
  0xfa   : > { %v1131_v46 = vsel %vm466_vm9, %v438_v54, 0.0  ;;  %v1123_v58 = vadd.f32 %v1122_v9, %v1121_v22  ;;  %v1130_v19 = vadd.f32 %v1129_v13, %v1128_v29  ;;  %v1138_v25 = vsel %vm466_vm9, %v439_v11, 0.0 }
  0xfb   : > { %v1132_v33 = vrot.slane %v1131_v46, 4  ;;  %v1139_v40 = vrot.slane %v1138_v25, 4  ;;  %v1145_v61 = vsel %vm466_vm9, %v440_v62, 0.0  ;;  %v1152_v45 = vsel %vm466_vm9, %v441_v17, 0.0 }
  0xfc   : > { %v1159_v31 = vsel %vm466_vm9, %v442_v30, 0.0  ;;  %v1336_v63 = vsel %vm733_vm15, %v1123_v58, %v1335_v32  ;;  %v1146_v39 = vrot.slane %v1145_v61, 4  ;;  %v1153_v24 = vrot.slane %v1152_v45, 4 }
  0xfd   : > { %v1133_v49 = vadd.f32 %v1132_v33, %v1131_v46  ;;  %v1337_v48 = vsel %vm735_vm0, %v1130_v19, %v1336_v63  ;;  %v1140_v53 = vadd.f32 %v1139_v40, %v1138_v25  ;;  %v1160_v52 = vrot.slane %v1159_v31, 4 }
  0xfe   : > { %v1166_v44 = vsel %vm466_vm9, %v443_v16, 0.0  ;;  %v1363_v54 = vadd.f32 %v1337_v48, %v1071_v42  ;;  %v1147_v60 = vadd.f32 %v1146_v39, %v1145_v61  ;;  %v1154_v23 = vadd.f32 %v1153_v24, %v1152_v45 }
  0xff   : > { %v1134_v43 = vrot.slane %v1133_v49, 2  ;;  %v1141_v56 = vrot.slane %v1140_v53, 2  ;;  %v1161_v0 = vadd.f32 %v1160_v52, %v1159_v31  ;;  %v1167_v51 = vrot.slane %v1166_v44, 4 }
 0x100   : > { %v1173_v14 = vsel %vm466_vm9, %v444_v10, 0.0  ;;  %1367 = vst.msk [vmem:[#allocation10] sm:$0xff] %vm766_vm8, %v1363_v54  ;;  %v1148_v22 = vrot.slane %v1147_v60, 2  ;;  %v1155_v29 = vrot.slane %v1154_v23, 2  ;;  %v1180_v17 = vsel %vm466_vm9, %v445_v38, 0.0 }
 0x101   : > { %v1135_v11 = vadd.f32 %v1134_v43, %v1133_v49  ;;  %v1174_v20 = vrot.slane %v1173_v14, 4  ;;  %v1142_v62 = vadd.f32 %v1141_v56, %v1140_v53  ;;  %v1162_v59 = vrot.slane %v1161_v0, 2 }
 0x102   : > { %v1168_v28 = vadd.f32 %v1167_v51, %v1166_v44  ;;  %v1149_v9 = vadd.f32 %v1148_v22, %v1147_v60  ;;  %v1156_v13 = vadd.f32 %v1155_v29, %v1154_v23  ;;  %v1181_v58 = vrot.slane %v1180_v17, 4 }
 0x103   : > { %v1136_v30 = vrot.slane %v1135_v11, 1  ;;  %v1175_v35 = vadd.f32 %v1174_v20, %v1173_v14  ;;  %v1143_v16 = vrot.slane %v1142_v62, 1  ;;  %v1163_v32 = vadd.f32 %v1162_v59, %v1161_v0 }
 0x104   : > { %v1169_v46 = vrot.slane %v1168_v28, 2  ;;  %v1150_v19 = vrot.slane %v1149_v9, 1  ;;  %v1157_v33 = vrot.slane %v1156_v13, 1  ;;  %v1182_v45 = vadd.f32 %v1181_v58, %v1180_v17 }
 0x105   : > { %v1137_v10 = vadd.f32 %v1136_v30, %v1135_v11  ;;  %v1176_v25 = vrot.slane %v1175_v35, 2  ;;  %v1144_v42 = vadd.f32 %v1143_v16, %v1142_v62  ;;  %v1164_v40 = vrot.slane %v1163_v32, 1 }
 0x106   : > { %v1170_v61 = vadd.f32 %v1169_v46, %v1168_v28  ;;  %v1151_v31 = vadd.f32 %v1150_v19, %v1149_v9  ;;  %v1158_v63 = vadd.f32 %v1157_v33, %v1156_v13  ;;  %vm2697_vm2 = vcmp.eq.s32.totalorder %v2012_v1, 2 }
 0x107   : > { %v1177_v49 = vadd.f32 %v1176_v25, %v1175_v35  ;;  %v446_v38 = vsel %vm2697_vm2, %v2322_v41, 0.0  ;;  %v1165_v39 = vadd.f32 %v1164_v40, %v1163_v32  ;;  %v1183_v48 = vrot.slane %v1182_v45, 2 }
 0x108   : > { %v1171_v24 = vrot.slane %v1170_v61, 1  ;;  %vm2698_vm3 = vcmask 1041409   ;;  %vm2699_vm6 = vcmp.eq.s32.totalorder %v2014_v2, 2  ;;  %vm2700_vm1 = vcmp.eq.s32.totalorder %v2016_v3, 2 }
 0x109   : > { %v1338_v53 = vsel %vm2698_vm3, %v1144_v42, %v1137_v10  ;;  %v1178_v52 = vrot.slane %v1177_v49, 1  ;;  %v447_v54 = vsel %vm2699_vm6, %v2328_v55, 0.0  ;;  %v448_v43 = vsel %vm2700_vm1, %v2334_v15, 0.0 }
 0x10a   : > { %v1339_v44 = vsel %vm725_vm11, %v1151_v31, %v1338_v53  ;;  %v1172_v60 = vadd.f32 %v1171_v24, %v1170_v61  ;;  %v1184_v23 = vadd.f32 %v1183_v48, %v1182_v45  ;;  %vm2701_vm2 = vcmp.eq.s32.totalorder %v2018_v4, 2 }
 0x10b   : > { %v1340_v41 = vsel %vm727_vm12, %v1158_v63, %v1339_v44  ;;  %v449_v56 = vsel %vm2701_vm2, %v2341_v27, 0.0  ;;  %v1179_v0 = vadd.f32 %v1178_v52, %v1177_v49  ;;  %vm2702_vm3 = vcmp.eq.s32.totalorder %v2020_v5, 2 }
 0x10c   : > { %v1341_v51 = vsel %vm729_vm13, %v1165_v39, %v1340_v41  ;;  %v450_v14 = vsel %vm2702_vm3, %v2347_v37, 0.0  ;;  %vm2703_vm6 = vcmp.eq.s32.totalorder %v2022_v6, 2  ;;  %v1185_v15 = vrot.slane %v1184_v23, 1 }
 0x10d   : > { %v451_v55 = vsel %vm2703_vm6, %v2352_v50, 0.0  ;;  %v1342_v11 = vsel %vm731_vm14, %v1172_v60, %v1341_v51  ;;  %vm2704_vm1 = vcmp.eq.s32.totalorder %v2024_v7, 2  ;;  %vm2705_vm2 = vcmp.eq.s32.totalorder %v2026_v8, 2  ;;  %v1072_v50 = vld [vmem:[#allocation10 + $0x8] sm:$0xff] }
 0x10e   : > { %v452_v22 = vsel %vm2704_vm1, %v2359_v12, 0.0  ;;  %v453_v27 = vsel %vm2705_vm2, %v2363_v18, 0.0  ;;  %v1343_v29 = vsel %vm733_vm15, %v1179_v0, %v1342_v11  ;;  %v1187_v20 = vsel %vm466_vm9, %v446_v38, 0.0 }
 0x10f   : > { %v1194_v37 = vsel %vm466_vm9, %v447_v54, 0.0  ;;  %v1201_v62 = vsel %vm466_vm9, %v448_v43, 0.0  ;;  %v1186_v59 = vadd.f32 %v1185_v15, %v1184_v23  ;;  %v1188_v28 = vrot.slane %v1187_v20, 4 }
 0x110   : > { %v1195_v17 = vrot.slane %v1194_v37, 4  ;;  %v1202_v30 = vrot.slane %v1201_v62, 4  ;;  %v1208_v9 = vsel %vm466_vm9, %v449_v56, 0.0  ;;  %v1215_v12 = vsel %vm466_vm9, %v450_v14, 0.0 }
 0x111   : > { %v1222_v13 = vsel %vm466_vm9, %v451_v55, 0.0  ;;  %v1229_v18 = vsel %vm466_vm9, %v452_v22, 0.0  ;;  %v1344_v35 = vsel %vm735_vm0, %v1186_v59, %v1343_v29  ;;  %v1189_v16 = vadd.f32 %v1188_v28, %v1187_v20 }
 0x112   : > { %v1196_v32 = vadd.f32 %v1195_v17, %v1194_v37  ;;  %v1203_v46 = vadd.f32 %v1202_v30, %v1201_v62  ;;  %v1364_v58 = vadd.f32 %v1344_v35, %v1072_v50  ;;  %v1209_v10 = vrot.slane %v1208_v9, 4 }
 0x113   : > { %v1216_v19 = vrot.slane %v1215_v12, 4  ;;  %v1223_v33 = vrot.slane %v1222_v13, 4  ;;  %v1190_v25 = vrot.slane %v1189_v16, 2  ;;  %v1230_v61 = vrot.slane %v1229_v18, 4 }
 0x114   : > { %v1197_v42 = vrot.slane %v1196_v32, 2  ;;  %v1204_v40 = vrot.slane %v1203_v46, 2  ;;  %1368 = vst.msk [vmem:[#allocation10 + $0x8] sm:$0xff] %vm766_vm8, %v1364_v58  ;;  %v1210_v45 = vadd.f32 %v1209_v10, %v1208_v9  ;;  %v1236_v49 = vsel %vm466_vm9, %v453_v27, 0.0  ;;  %v2710_v58 = vld [vmem:[#allocation16_spill] sm:$0xff] }
 0x115   : > { %v1217_v31 = vadd.f32 %v1216_v19, %v1215_v12  ;;  %v1224_v63 = vadd.f32 %v1223_v33, %v1222_v13  ;;  %v1191_v38 = vadd.f32 %v1190_v25, %v1189_v16  ;;  %v1231_v48 = vadd.f32 %v1230_v61, %v1229_v18 }
 0x116   : > { %v1198_v39 = vadd.f32 %v1197_v42, %v1196_v32  ;;  %v1205_v24 = vadd.f32 %v1204_v40, %v1203_v46  ;;  %v1211_v53 = vrot.slane %v1210_v45, 2  ;;  %v1237_v54 = vrot.slane %v1236_v49, 4 }
 0x117   : > { %v1218_v52 = vrot.slane %v1217_v31, 2  ;;  %v1225_v44 = vrot.slane %v1224_v63, 2  ;;  %v1192_v43 = vrot.slane %v1191_v38, 1  ;;  %v1232_v41 = vrot.slane %v1231_v48, 2 }
 0x118   : > { %v1199_v60 = vrot.slane %v1198_v39, 1  ;;  %v1206_v23 = vrot.slane %v1205_v24, 1  ;;  %v1212_v56 = vadd.f32 %v1211_v53, %v1210_v45  ;;  %v1238_v14 = vadd.f32 %v1237_v54, %v1236_v49 }
 0x119   : > { %v1219_v0 = vadd.f32 %v1218_v52, %v1217_v31  ;;  %v1226_v51 = vadd.f32 %v1225_v44, %v1224_v63  ;;  %v1193_v55 = vadd.f32 %v1192_v43, %v1191_v38  ;;  %v1233_v22 = vadd.f32 %v1232_v41, %v1231_v48 }
 0x11a   : > { %v1200_v15 = vadd.f32 %v1199_v60, %v1198_v39  ;;  %v1207_v11 = vadd.f32 %v1206_v23, %v1205_v24  ;;  %v1213_v27 = vrot.slane %v1212_v56, 1  ;;  %v1239_v37 = vrot.slane %v1238_v14, 2 }
 0x11b   : > { %v1220_v29 = vrot.slane %v1219_v0, 1  ;;  %v1227_v20 = vrot.slane %v1226_v51, 1  ;;  %v1234_v62 = vrot.slane %v1233_v22, 1  ;;  %vm2706_vm3 = vcmask 1041409  }
 0x11c   : > { %v1345_v50 = vsel %vm2706_vm3, %v1200_v15, %v1193_v55  ;;  %v454_v59 = vsel %vm358_vm7, %v2370_v36, 0.0  ;;  %v455_v28 = vsel %vm359_vm5, %v2376_v57, 0.0  ;;  %v1214_v17 = vadd.f32 %v1213_v27, %v1212_v56  ;;  %v2708_v57 = vld [vmem:[#allocation15_spill] sm:$0xff] }
 0x11d   : > { %v1221_v30 = vadd.f32 %v1220_v29, %v1219_v0  ;;  %v1228_v9 = vadd.f32 %v1227_v20, %v1226_v51  ;;  %v1240_v12 = vadd.f32 %v1239_v37, %v1238_v14  ;;  %v1235_v13 = vadd.f32 %v1234_v62, %v1233_v22 }
 0x11e   : > { %v1346_v18 = vsel %vm725_vm11, %v1207_v11, %v1345_v50  ;;  %v456_v35 = vsel %vm360_vm10, %v2383_v21, 0.0  ;;  %v457_v1 = vsel %vm361_vm4, %v2389_v34, 0.0  ;;  %vm2707_vm5 = vcmp.eq.s32.totalorder %v2020_v5, 3  ;;  %v1073_v34 = vld [vmem:[#allocation10 + $0x10] sm:$0xff] }
 0x11f   : > { %v1241_v36 = vrot.slane %v1240_v12, 1  ;;  %v1347_v16 = vsel %vm727_vm12, %v1214_v17, %v1346_v18  ;;  %v458_v2 = vsel %vm2707_vm5, %v2394_v47, 0.0  ;;  %vm2709_vm7 = vcmp.eq.s32.totalorder %v2022_v6, 3 }
 0x120   : > { %v459_v32 = vsel %vm2709_vm7, %v2708_v57, 0.0  ;;  %v1348_v46 = vsel %vm729_vm13, %v1221_v30, %v1347_v16  ;;  %vm2711_vm10 = vcmp.eq.s32.totalorder %v2024_v7, 3  ;;  %vm2712_vm4 = vcmp.eq.s32.totalorder %v2026_v8, 3 }
 0x121   : > { %v460_v3 = vsel %vm2711_vm10, %v2710_v58, 0.0  ;;  %v461_v4 = vsel %vm2712_vm4, %v2411_v26, 0.0  ;;  %v1243_v21 = vsel %vm466_vm9, %v454_v59, 0.0  ;;  %v1242_v10 = vadd.f32 %v1241_v36, %v1240_v12 }
 0x122   : > { %v1349_v5 = vsel %vm731_vm14, %v1228_v9, %v1348_v46  ;;  %v1244_v47 = vrot.slane %v1243_v21, 4  ;;  %v1250_v6 = vsel %vm466_vm9, %v455_v28, 0.0  ;;  %v1257_v25 = vsel %vm466_vm9, %v456_v35, 0.0 }
 0x123   : > { %v1350_v19 = vsel %vm733_vm15, %v1235_v13, %v1349_v5  ;;  %v1251_v33 = vrot.slane %v1250_v6, 4  ;;  %v1264_v7 = vsel %vm466_vm9, %v457_v1, 0.0  ;;  %v1258_v26 = vrot.slane %v1257_v25, 4  ;;  %v1074_v5 = vld [vmem:[#allocation10 + $0x18] sm:$0xff] }
 0x124   : > { %v1351_v42 = vsel %vm735_vm0, %v1242_v10, %v1350_v19  ;;  %v1245_v8 = vadd.f32 %v1244_v47, %v1243_v21  ;;  %v1265_v40 = vrot.slane %v1264_v7, 4  ;;  %v1271_v31 = vsel %vm466_vm9, %v458_v2, 0.0 }
 0x125   : > { %v1365_v61 = vadd.f32 %v1351_v42, %v1073_v34  ;;  %v1252_v45 = vadd.f32 %v1251_v33, %v1250_v6  ;;  %v1278_v63 = vsel %vm466_vm9, %v459_v32, 0.0  ;;  %v1259_v38 = vadd.f32 %v1258_v26, %v1257_v25 }
 0x126   : > { %v1246_v49 = vrot.slane %v1245_v8, 2  ;;  %v1266_v39 = vadd.f32 %v1265_v40, %v1264_v7  ;;  %v1272_v24 = vrot.slane %v1271_v31, 4  ;;  %v1279_v53 = vrot.slane %v1278_v63, 4 }
 0x127   : > { %1369 = vst.msk [vmem:[#allocation10 + $0x10] sm:$0xff] %vm766_vm8, %v1365_v61  ;;  %v1253_v48 = vrot.slane %v1252_v45, 2  ;;  %v1285_v52 = vsel %vm466_vm9, %v460_v3, 0.0  ;;  %v1292_v44 = vsel %vm466_vm9, %v461_v4, 0.0  ;;  %v1260_v43 = vrot.slane %v1259_v38, 2  ;;  %vm2713_vm9 = vmmov %vm2706_vm3 }
 0x128   : > { %v1247_v54 = vadd.f32 %v1246_v49, %v1245_v8  ;;  %v1267_v60 = vrot.slane %v1266_v39, 2  ;;  %v1273_v23 = vadd.f32 %v1272_v24, %v1271_v31  ;;  %v1280_v56 = vadd.f32 %v1279_v53, %v1278_v63 }
 0x129   : > { %v1254_v41 = vadd.f32 %v1253_v48, %v1252_v45  ;;  %v1286_v0 = vrot.slane %v1285_v52, 4  ;;  %v1293_v51 = vrot.slane %v1292_v44, 4  ;;  %v1261_v55 = vadd.f32 %v1260_v43, %v1259_v38 }
 0x12a   : > { %v1248_v14 = vrot.slane %v1247_v54, 1  ;;  %v1268_v15 = vadd.f32 %v1267_v60, %v1266_v39  ;;  %v1274_v11 = vrot.slane %v1273_v23, 2  ;;  %v1281_v27 = vrot.slane %v1280_v56, 2 }
 0x12b   : > { %v1255_v22 = vrot.slane %v1254_v41, 1  ;;  %v1287_v29 = vadd.f32 %v1286_v0, %v1285_v52  ;;  %v1294_v20 = vadd.f32 %v1293_v51, %v1292_v44  ;;  %v1262_v62 = vrot.slane %v1261_v55, 1 }
 0x12c   : > { %v1249_v37 = vadd.f32 %v1248_v14, %v1247_v54  ;;  %v1269_v50 = vrot.slane %v1268_v15, 1  ;;  %v1275_v59 = vadd.f32 %v1274_v11, %v1273_v23  ;;  %v1282_v17 = vadd.f32 %v1281_v27, %v1280_v56 }
 0x12d   : > { %v1256_v28 = vadd.f32 %v1255_v22, %v1254_v41  ;;  %v1288_v30 = vrot.slane %v1287_v29, 2  ;;  %v1295_v9 = vrot.slane %v1294_v20, 2  ;;  %v1263_v12 = vadd.f32 %v1262_v62, %v1261_v55 }
 0x12e   : > { %v1270_v13 = vadd.f32 %v1269_v50, %v1268_v15  ;;  %v1276_v18 = vrot.slane %v1275_v59, 1  ;;  %v1283_v35 = vrot.slane %v1282_v17, 1 }
 0x12f   : > { %v1289_v1 = vadd.f32 %v1288_v30, %v1287_v29  ;;  %v1296_v36 = vadd.f32 %v1295_v9, %v1294_v20  ;;  %v1352_v16 = vsel %vm2713_vm9, %v1256_v28, %v1249_v37 }
 0x130   : > { %v1277_v2 = vadd.f32 %v1276_v18, %v1275_v59  ;;  %v1353_v57 = vsel %vm725_vm11, %v1263_v12, %v1352_v16  ;;  %v1284_v32 = vadd.f32 %v1283_v35, %v1282_v17 }
 0x131   : > { %v1290_v46 = vrot.slane %v1289_v1, 1  ;;  %v1297_v58 = vrot.slane %v1296_v36, 1  ;;  %v1354_v3 = vsel %vm727_vm12, %v1270_v13, %v1353_v57 }
 0x132   : > { %v1355_v4 = vsel %vm729_vm13, %v1277_v2, %v1354_v3 }
 0x133   : > { %v1291_v21 = vadd.f32 %v1290_v46, %v1289_v1  ;;  %v1298_v34 = vadd.f32 %v1297_v58, %v1296_v36  ;;  %v1356_v10 = vsel %vm731_vm14, %v1284_v32, %v1355_v4 }
 0x135   : > { %v1357_v47 = vsel %vm733_vm15, %v1291_v21, %v1356_v10 }
 0x136   : > { %v1358_v6 = vsel %vm735_vm0, %v1298_v34, %v1357_v47 }
 0x137   : > { %v1366_v19 = vadd.f32 %v1358_v6, %v1074_v5 }
 0x139   : > { %1370 = vst.msk [vmem:[#allocation10 + $0x18] sm:$0xff] %vm766_vm8, %v1366_v19 }
 0x13a   : > { %1789 = shalt.err (!%p1786_p12)
}
 0x13b   : > { %1594 = dma.vmem_to_hbm [thread:$0]  (%p2278_p7), %s1413_s25, 512, %s2638_s4, [#allocation9], %s1871_s24, %s1871_s24, %s1872_s29  }
 0x13c   : > { %1833 = dma.done.wait (%p2278_p7), [#allocation4], 512  }
 0x13d   : > { %1835 = vsyncadd (%p2278_p7), [#allocation4], 4294966784 }
 0x13e   : > { %1837 = dma.done.wait (%p2278_p7), [#allocation9], 1024  }
 0x13f   : > { %1839 = vsyncadd (%p2278_p7), [#allocation9], 4294966272 }
 0x140 PF: > { %s23_s20 = sadd.s32 1, %s1862_s20   ;;  %s2714_s15 = smov %s1846_s16 }
 0x141   : > { %p20_p13 = scmp.ge.s32.totalorder %s23_s20, 4   ;;  %s2715_s16 = smov %s1850_s17 }
 0x142   : > { %s2716_s17 = smov %s1951_s27  ;;  %s2717_s18 = smov %s1858_s19 }
 0x143   : > { %s2718_s19 = smov %s2720_s22  ;;  %22 = sbr.rel (!%p20_p13) target bundleno = 8 (0x8), region = 101 }
 0x148   :  { %1436 = vsyncpa [#allocation3], 1 }
 0x149   :  { %1438 = vsyncpa [#allocation3 + $0x1], 1 }
 0x14a   :  { %1439 = vsyncpa [#allocation6], 1 }
 0x14b   :  { %1441 = vsyncpa [#allocation6 + $0x1], 1 }
 0x14c   :  { %1442 = vsyncpa [#allocation4], 1 }
 0x14d   :  { %1444 = vsyncpa [#allocation4 + $0x1], 1 }
 0x14e   :  { %1445 = vsyncpa [#allocation9], 1 }

</bundles_post_ra>
